<compile_context>
chip_gen: v5e
topology: v5e:2x2
jax: 0.10.0
libtpu: 0.0.40
codegen_flags: <defaults>
</compile_context>

<pallas_src>
import functools
import math

import jax
import jax.numpy as jnp
from jax.experimental import pallas as pl
from jax.experimental.pallas import tpu as pltpu


# ---------------------------------------------------------------------------
# Fused decoder-block kernel (one grid step == one batch element)
# ---------------------------------------------------------------------------

def _decoder_block_kernel(*refs, num_heads, causal, ln_eps=1e-5):
    if causal:
        x_ref, enc_ref, pad_ref, *w_refs, o_ref = refs
        la_ref = None
    else:
        x_ref, enc_ref, la_ref, pad_ref, *w_refs, o_ref = refs
    (wqkv1_ref, bqkv1_ref, wo1_ref, bo1_ref, g1_ref, be1_ref,
     wq2_ref, bq2_ref, wkv2_ref, bkv2_ref, wo2_ref, bo2_ref, g2_ref, be2_ref,
     fw1_ref, fb1_ref, fw2_ref, fb2_ref, g3_ref, be3_ref) = w_refs

    bf16, f32 = jnp.bfloat16, jnp.float32

    x = x_ref[0]                       # [Sq, d_model] f32
    enc = enc_ref[0]                   # [Sk, d_model] f32
    sq, d_model = x.shape
    depth = d_model // num_heads
    scale = 1.0 / math.sqrt(depth)

    # ---- attention bias terms (head-invariant, computed once) ----
    if causal:
        # In-kernel causal mask: zero HBM traffic, VPU iota+select under MXU work.
        row = jax.lax.broadcasted_iota(jnp.int32, (sq, sq), 0)
        col = jax.lax.broadcasted_iota(jnp.int32, (sq, sq), 1)
        la_bias = jnp.where(col > row, f32(-1e9), f32(0.0))          # [Sq, Sq]
    else:
        la_bias = la_ref[0] * f32(-1e9)                              # [*, Sq]
    pad_bias = pad_ref[0] * f32(-1e9)                                # [*, Sk]

    def mha(q, k, v, wo_ref, bo_ref, bias):
        """Multi-head attention with the output projection fused per head.

        q: [Sq, d_model] bf16, k/v: [Sk, d_model] bf16, bias broadcastable to
        [Sq, Sk], wo_ref: [H, depth, d_model] bf16.  Uses the identity
        concat_h(ctx_h) @ Wo == sum_h ctx_h @ Wo[h]  -> no lane-dim concat.
        """
        acc = None
        for h in range(num_heads):                       # unrolled; H is small
            sl = slice(h * depth, (h + 1) * depth)
            qh, kh, vh = q[:, sl], k[:, sl], v[:, sl]
            # q @ k^T: contract last dim of both (no materialized k.T per head)
            logits = jax.lax.dot_general(
                qh, kh, (((1,), (1,)), ((), ())),
                preferred_element_type=f32) * scale
            logits = logits + bias
            logits = logits - jnp.max(logits, axis=-1, keepdims=True)
            p = jnp.exp(logits)
            p = p * pl.reciprocal(jnp.sum(p, axis=-1, keepdims=True), approx=True)
            ctx = jnp.dot(p.astype(bf16), vh, preferred_element_type=f32)
            part = jnp.dot(ctx.astype(bf16), wo_ref[h], preferred_element_type=f32)
            acc = part if acc is None else acc + part
        return acc + bo_ref[...]

    def add_layernorm(a, b, g, beta):
        # residual add + LayerNorm (PyTorch semantics: biased var, eps=1e-5)
        z = (a + b).astype(f32)
        mean = jnp.mean(z, axis=-1, keepdims=True)
        c = z - mean
        var = jnp.mean(c * c, axis=-1, keepdims=True)
        return c * jax.lax.rsqrt(var + ln_eps) * g + beta

    # ---- self-attention (fused QKV projection; bf16 MXU / f32 accumulate) ----
    qkv = jnp.dot(x.astype(bf16), wqkv1_ref[...],
                  preferred_element_type=f32) + bqkv1_ref[...]
    q1 = qkv[:, :d_model].astype(bf16)
    k1 = qkv[:, d_model:2 * d_model].astype(bf16)
    v1 = qkv[:, 2 * d_model:].astype(bf16)
    attn1 = mha(q1, k1, v1, wo1_ref, bo1_ref, la_bias)
    a1 = add_layernorm(x, attn1, g1_ref[...], be1_ref[...])

    # ---- cross-attention (fused KV projection over encoder outputs) ----
    q2 = (jnp.dot(a1.astype(bf16), wq2_ref[...],
                  preferred_element_type=f32) + bq2_ref[...]).astype(bf16)
    kv2 = jnp.dot(enc.astype(bf16), wkv2_ref[...],
                  preferred_element_type=f32) + bkv2_ref[...]
    k2 = kv2[:, :d_model].astype(bf16)
    v2 = kv2[:, d_model:].astype(bf16)
    attn2 = mha(q2, k2, v2, wo2_ref, bo2_ref, pad_bias)
    # dropout_1 = identity (eval mode)
    a2 = add_layernorm(a1, attn2, g2_ref[...], be2_ref[...])

    # ---- feed-forward: Linear -> ReLU -> Linear ----
    h = jnp.dot(a2.astype(bf16), fw1_ref[...],
                preferred_element_type=f32) + fb1_ref[...]
    h = jnp.maximum(h, 0.0).astype(bf16)
    ff = jnp.dot(h, fw2_ref[...], preferred_element_type=f32) + fb2_ref[...]
    # dropout_3 = identity (eval mode)
    out = add_layernorm(a2, ff, g3_ref[...], be3_ref[...])

    o_ref[0] = out.astype(o_ref.dtype)


# ---------------------------------------------------------------------------
# BlockSpec / mask helpers
# ---------------------------------------------------------------------------

def _resident_spec(shape):
    """Grid-invariant input: constant index_map (DMA'd once) and a single VMEM
    buffer (no pointless double-buffering) when pipeline_mode is available."""
    ndim = len(shape)
    index_map = lambda b: (0,) * ndim
    try:
        return pl.BlockSpec(shape, index_map, pipeline_mode=pl.Buffered(1))
    except (AttributeError, TypeError):
        # Older Pallas build without pipeline_mode: fall back to the default.
        return pl.BlockSpec(shape, index_map)


def _batched_mask_spec(shape):
    """Mask spec: fetched once if batch-invariant, else one [1, q, k] block/batch."""
    if shape[0] == 1:
        return _resident_spec(shape)
    return pl.BlockSpec((1,) + tuple(shape[1:]), lambda b: (b, 0, 0))


def _normalize_mask(mask, batch, key_len, default_shape):
    """Collapse a head-invariant additive mask to [Bm, q, key_len], Bm in {1,B}."""
    if mask is None:
        return jnp.zeros(default_shape, jnp.float32)
    m = jnp.asarray(mask, jnp.float32)
    while m.ndim < 4:
        m = m[None]
    if m.ndim != 4 or m.shape[1] != 1:
        raise NotImplementedError(
            "head-dependent attention masks are not supported by this kernel")
    if m.shape[0] not in (1, batch):
        raise ValueError(f"mask batch dim {m.shape[0]} incompatible with B={batch}")
    m = jnp.broadcast_to(m, m.shape[:3] + (key_len,))
    return m[:, 0]                                      # [Bm, q, key_len]


# ---------------------------------------------------------------------------
# Wrapper: weight fusion + pallas_call setup
# ---------------------------------------------------------------------------

def decoder_block(params, inputs, enc_outputs, padding_mask, look_ahead_mask,
                  num_heads, *, self_attn_causal=False,
                  vmem_limit_bytes=48 * 1024 * 1024):
    """Fused DecoderBlock forward (inference).

    If self_attn_causal=True the standard causal look-ahead mask is generated
    inside the kernel and `look_ahead_mask` is ignored (zero mask HBM traffic).
    """
    B, Sq, d_model = inputs.shape
    Sk = enc_outputs.shape[1]
    assert d_model % num_heads == 0
    depth = d_model // num_heads
    bf16, f32 = jnp.bfloat16, jnp.float32

    p1, p2 = params["attn1"], params["attn2"]

    def vec2(v):
        return jnp.asarray(v, f32).reshape(1, -1)

    # bf16 matmul weights (f32 accumulation in-kernel); fuse Q|K|V and K|V.
    wqkv1 = jnp.concatenate([p1["wq"], p1["wk"], p1["wv"]], axis=1).astype(bf16)
    bqkv1 = vec2(jnp.concatenate([p1["bq"], p1["bk"], p1["bv"]]))
    wkv2 = jnp.concatenate([p2["wk"], p2["wv"]], axis=1).astype(bf16)
    bkv2 = vec2(jnp.concatenate([p2["bk"], p2["bv"]]))
    # Output projections reshaped to [H, depth, d_model] so the kernel can fuse
    # them into the head loop with clean per-head tiles (no sublane-offset slices).
    wo1 = p1["wo"].astype(bf16).reshape(num_heads, depth, d_model)
    wo2 = p2["wo"].astype(bf16).reshape(num_heads, depth, d_model)

    weights = [
        wqkv1, bqkv1, wo1, vec2(p1["bo"]),
        vec2(params["ln1_g"]), vec2(params["ln1_b"]),
        p2["wq"].astype(bf16), vec2(p2["bq"]), wkv2, bkv2, wo2, vec2(p2["bo"]),
        vec2(params["ln2_g"]), vec2(params["ln2_b"]),
        params["ff_w1"].astype(bf16), vec2(params["ff_b1"]),
        params["ff_w2"].astype(bf16), vec2(params["ff_b2"]),
        vec2(params["ln3_g"]), vec2(params["ln3_b"]),
    ]

    pad = _normalize_mask(padding_mask, B, Sk, default_shape=(1, 1, Sk))

    args = [inputs, enc_outputs]
    in_specs = [
        pl.BlockSpec((1, Sq, d_model), lambda b: (b, 0, 0)),   # decoder inputs
        pl.BlockSpec((1, Sk, d_model), lambda b: (b, 0, 0)),   # encoder outputs
    ]
    if not self_attn_causal:
        la = _normalize_mask(look_ahead_mask, B, Sq, default_shape=(1, 1, Sq))
        args.append(la)
        in_specs.append(_batched_mask_spec(la.shape))
    args.append(pad)
    in_specs.append(_batched_mask_spec(pad.shape))

    args += weights
    in_specs += [_resident_spec(w.shape) for w in weights]

    kern = functools.partial(_decoder_block_kernel, num_heads=num_heads,
                             causal=self_attn_causal)

    return pl.pallas_call(
        kern,
        out_shape=jax.ShapeDtypeStruct((B, Sq, d_model), inputs.dtype),
        grid=(B,),
        in_specs=in_specs,
        out_specs=pl.BlockSpec((1, Sq, d_model), lambda b: (b, 0, 0)),
        compiler_params=pltpu.CompilerParams(
            dimension_semantics=("parallel",),    # shard batch across TCs (v7x)
            vmem_limit_bytes=vmem_limit_bytes),
    )(*args)


# ---------------------------------------------------------------------------
# Pure-JAX reference (mirrors the PyTorch module, f32) + parameter init
# ---------------------------------------------------------------------------

def decoder_block_reference(params, inputs, enc_outputs, padding_mask,
                            look_ahead_mask, num_heads):
    def mha(p, q_in, kv_in, mask):
        B, Sq, d = q_in.shape
        dep = d // num_heads
        q = q_in @ p["wq"] + p["bq"]
        k = kv_in @ p["wk"] + p["bk"]
        v = kv_in @ p["wv"] + p["bv"]
        split = lambda t: jnp.transpose(t.reshape(B, -1, num_heads, dep), (0, 2, 1, 3))
        q, k, v = split(q), split(k), split(v)
        logits = (q @ jnp.swapaxes(k, 2, 3)) / math.sqrt(dep)
        if mask is not None:
            logits = logits + jnp.asarray(mask, jnp.float32) * -1e9
        w = jax.nn.softmax(logits, axis=-1)
        ctx = jnp.transpose(w @ v, (0, 2, 1, 3)).reshape(B, Sq, d)
        return ctx @ p["wo"] + p["bo"]

    def ln(z, g, b, eps=1e-5):
        mu = z.mean(-1, keepdims=True)
        var = ((z - mu) ** 2).mean(-1, keepdims=True)
        return (z - mu) / jnp.sqrt(var + eps) * g + b

    a1 = ln(inputs + mha(params["attn1"], inputs, inputs, look_ahead_mask),
            params["ln1_g"], params["ln1_b"])
    a2 = ln(a1 + mha(params["attn2"], a1, enc_outputs, padding_mask),
            params["ln2_g"], params["ln2_b"])
    h = jnp.maximum(a2 @ params["ff_w1"] + params["ff_b1"], 0.0)
    ff = h @ params["ff_w2"] + params["ff_b2"]
    return ln(a2 + ff, params["ln3_g"], params["ln3_b"])


def _init_linear(key, d_in, d_out):
    kw, kb = jax.random.split(key)
    w = jax.random.normal(kw, (d_in, d_out), jnp.float32) / jnp.sqrt(d_in)
    b = jax.random.normal(kb, (d_out,), jnp.float32) * 0.01
    return w, b


def _init_mha(key, d_model):
    ks = jax.random.split(key, 4)
    wq, bq = _init_linear(ks[0], d_model, d_model)
    wk, bk = _init_linear(ks[1], d_model, d_model)
    wv, bv = _init_linear(ks[2], d_model, d_model)
    wo, bo = _init_linear(ks[3], d_model, d_model)
    return dict(wq=wq, bq=bq, wk=wk, bk=bk, wv=wv, bv=bv, wo=wo, bo=bo)


def init_decoder_block(key, d_ff, d_model):
    ks = jax.random.split(key, 4)
    ffw1, ffb1 = _init_linear(ks[2], d_model, d_ff)
    ffw2, ffb2 = _init_linear(ks[3], d_ff, d_model)
    return dict(
        attn1=_init_mha(ks[0], d_model),
        attn2=_init_mha(ks[1], d_model),
        ln1_g=jnp.ones((d_model,), jnp.float32), ln1_b=jnp.zeros((d_model,), jnp.float32),
        ln2_g=jnp.ones((d_model,), jnp.float32), ln2_b=jnp.zeros((d_model,), jnp.float32),
        ln3_g=jnp.ones((d_model,), jnp.float32), ln3_b=jnp.zeros((d_model,), jnp.float32),
        ff_w1=ffw1, ff_b1=ffb1, ff_w2=ffw2, ff_b2=ffb2,
    )


if __name__ == "__main__":
    B, S_dec, S_enc = 2, 8, 8
    d_model, num_heads, d_ff = 32, 4, 64

    root = jax.random.PRNGKey(0)
    k_params, k_in, k_enc = jax.random.split(root, 3)

    params = init_decoder_block(k_params, d_ff, d_model)
    inputs = jax.random.normal(k_in, (B, S_dec, d_model), jnp.float32)
    enc_outputs = jax.random.normal(k_enc, (B, S_enc, d_model), jnp.float32)

    # look-ahead (causal) mask: 1 above the diagonal -> masked
    look_ahead_mask = jnp.triu(jnp.ones((S_dec, S_dec), jnp.float32), k=1)[None, None]
    # padding mask over encoder positions: mask the last 2 positions
    padding_mask = jnp.zeros((B, S_enc), jnp.float32).at[:, -2:].set(1.0)[:, None, None, :]

    ref = decoder_block_reference(params, inputs, enc_outputs,
                                  padding_mask, look_ahead_mask, num_heads)

    # Optimized path: causal mask generated in-kernel (no mask DMA).
    fwd = jax.jit(functools.partial(decoder_block, num_heads=num_heads,
                                    self_attn_causal=True))
    out = fwd(params, inputs, enc_outputs, padding_mask, look_ahead_mask)
    jax.block_until_ready(out)

    # General path: explicit head-invariant look-ahead mask (fetched once).
    fwd_mask = jax.jit(functools.partial(decoder_block, num_heads=num_heads,
                                         self_attn_causal=False))
    out_mask = fwd_mask(params, inputs, enc_outputs, padding_mask, look_ahead_mask)
    jax.block_until_ready(out_mask)

    assert out.shape == (B, S_dec, d_model)
    # bf16 MXU operands + approx softmax reciprocal vs. the f32 reference.
    assert jnp.allclose(out, ref, atol=1e-1, rtol=1e-1)
    # In-kernel causal mask must agree with the explicit-mask path.
    assert jnp.allclose(out_mask, out, atol=1e-3, rtol=1e-3)
    print("KERNEL_OK")
</pallas_src>

<mosaic_0001>
module attributes {stable_mosaic.version = 11 : i64} {
  func.func @_decoder_block_kernel(%arg0: i32, %arg1: memref<1x8x32xf32, #tpu.memory_space<vmem>>, %arg2: memref<1x8x32xf32, #tpu.memory_space<vmem>>, %arg3: memref<1x1x8xf32, #tpu.memory_space<vmem>>, %arg4: memref<32x96xbf16, #tpu.memory_space<vmem>>, %arg5: memref<1x96xf32, #tpu.memory_space<vmem>>, %arg6: memref<4x8x32xbf16, #tpu.memory_space<vmem>>, %arg7: memref<1x32xf32, #tpu.memory_space<vmem>>, %arg8: memref<1x32xf32, #tpu.memory_space<vmem>>, %arg9: memref<1x32xf32, #tpu.memory_space<vmem>>, %arg10: memref<32x32xbf16, #tpu.memory_space<vmem>>, %arg11: memref<1x32xf32, #tpu.memory_space<vmem>>, %arg12: memref<32x64xbf16, #tpu.memory_space<vmem>>, %arg13: memref<1x64xf32, #tpu.memory_space<vmem>>, %arg14: memref<4x8x32xbf16, #tpu.memory_space<vmem>>, %arg15: memref<1x32xf32, #tpu.memory_space<vmem>>, %arg16: memref<1x32xf32, #tpu.memory_space<vmem>>, %arg17: memref<1x32xf32, #tpu.memory_space<vmem>>, %arg18: memref<32x64xbf16, #tpu.memory_space<vmem>>, %arg19: memref<1x64xf32, #tpu.memory_space<vmem>>, %arg20: memref<64x32xbf16, #tpu.memory_space<vmem>>, %arg21: memref<1x32xf32, #tpu.memory_space<vmem>>, %arg22: memref<1x32xf32, #tpu.memory_space<vmem>>, %arg23: memref<1x32xf32, #tpu.memory_space<vmem>>, %arg24: memref<1x8x32xf32, #tpu.memory_space<vmem>>) attributes {dimension_semantics = [#tpu.dimension_semantics<parallel>], iteration_bounds = array<i64: 2>, scalar_prefetch = 0 : i64, scratch_operands = 0 : i64, tpu.core_type = #tpu.core_type<tc>, window_params = [{transform_indices = @transform_0, window_bounds = array<i64: 1, 8, 32>}, {transform_indices = @transform_1, window_bounds = array<i64: 1, 8, 32>}, {transform_indices = @transform_2, window_bounds = array<i64: 1, 1, 8>}, {pipeline_mode = #tpu.pipeline_mode<synchronous>, transform_indices = @transform_3, window_bounds = array<i64: 32, 96>}, {pipeline_mode = #tpu.pipeline_mode<synchronous>, transform_indices = @transform_4, window_bounds = array<i64: 1, 96>}, {pipeline_mode = #tpu.pipeline_mode<synchronous>, transform_indices = @transform_5, window_bounds = array<i64: 4, 8, 32>}, {pipeline_mode = #tpu.pipeline_mode<synchronous>, transform_indices = @transform_6, window_bounds = array<i64: 1, 32>}, {pipeline_mode = #tpu.pipeline_mode<synchronous>, transform_indices = @transform_7, window_bounds = array<i64: 1, 32>}, {pipeline_mode = #tpu.pipeline_mode<synchronous>, transform_indices = @transform_8, window_bounds = array<i64: 1, 32>}, {pipeline_mode = #tpu.pipeline_mode<synchronous>, transform_indices = @transform_9, window_bounds = array<i64: 32, 32>}, {pipeline_mode = #tpu.pipeline_mode<synchronous>, transform_indices = @transform_10, window_bounds = array<i64: 1, 32>}, {pipeline_mode = #tpu.pipeline_mode<synchronous>, transform_indices = @transform_11, window_bounds = array<i64: 32, 64>}, {pipeline_mode = #tpu.pipeline_mode<synchronous>, transform_indices = @transform_12, window_bounds = array<i64: 1, 64>}, {pipeline_mode = #tpu.pipeline_mode<synchronous>, transform_indices = @transform_13, window_bounds = array<i64: 4, 8, 32>}, {pipeline_mode = #tpu.pipeline_mode<synchronous>, transform_indices = @transform_14, window_bounds = array<i64: 1, 32>}, {pipeline_mode = #tpu.pipeline_mode<synchronous>, transform_indices = @transform_15, window_bounds = array<i64: 1, 32>}, {pipeline_mode = #tpu.pipeline_mode<synchronous>, transform_indices = @transform_16, window_bounds = array<i64: 1, 32>}, {pipeline_mode = #tpu.pipeline_mode<synchronous>, transform_indices = @transform_17, window_bounds = array<i64: 32, 64>}, {pipeline_mode = #tpu.pipeline_mode<synchronous>, transform_indices = @transform_18, window_bounds = array<i64: 1, 64>}, {pipeline_mode = #tpu.pipeline_mode<synchronous>, transform_indices = @transform_19, window_bounds = array<i64: 64, 32>}, {pipeline_mode = #tpu.pipeline_mode<synchronous>, transform_indices = @transform_20, window_bounds = array<i64: 1, 32>}, {pipeline_mode = #tpu.pipeline_mode<synchronous>, transform_indices = @transform_21, window_bounds = array<i64: 1, 32>}, {pipeline_mode = #tpu.pipeline_mode<synchronous>, transform_indices = @transform_22, window_bounds = array<i64: 1, 32>}, {transform_indices = @transform_23, window_bounds = array<i64: 1, 8, 32>}]} {
    %c0 = arith.constant 0 : index
    %c0_0 = arith.constant 0 : index
    %c0_1 = arith.constant 0 : index
    %0 = vector.load %arg1[%c0, %c0_0, %c0_1] : memref<1x8x32xf32, #tpu.memory_space<vmem>>, vector<1x8x32xf32>
    %1 = vector.shape_cast %0 : vector<1x8x32xf32> to vector<8x32xf32>
    %c0_2 = arith.constant 0 : index
    %c0_3 = arith.constant 0 : index
    %c0_4 = arith.constant 0 : index
    %2 = vector.load %arg2[%c0_2, %c0_3, %c0_4] : memref<1x8x32xf32, #tpu.memory_space<vmem>>, vector<1x8x32xf32>
    %3 = vector.shape_cast %2 : vector<1x8x32xf32> to vector<8x32xf32>
    %4 = tpu.iota {dimensions = array<i32: 0>} : vector<8x8xi32>
    %5 = tpu.iota {dimensions = array<i32: 1>} : vector<8x8xi32>
    %6 = arith.cmpi sgt, %5, %4 : vector<8x8xi32>
    %cst = arith.constant -1.000000e+09 : f32
    %cst_5 = arith.constant 0.000000e+00 : f32
    %7 = vector.broadcast %cst : f32 to vector<8x8xf32>
    %8 = vector.broadcast %cst_5 : f32 to vector<8x8xf32>
    %9 = arith.select %6, %7, %8 : vector<8x8xi1>, vector<8x8xf32>
    %c0_6 = arith.constant 0 : index
    %c0_7 = arith.constant 0 : index
    %c0_8 = arith.constant 0 : index
    %10 = vector.load %arg3[%c0_6, %c0_7, %c0_8] : memref<1x1x8xf32, #tpu.memory_space<vmem>>, vector<1x1x8xf32>
    %11 = vector.shape_cast %10 : vector<1x1x8xf32> to vector<1x8xf32>
    %cst_9 = arith.constant -1.000000e+09 : f32
    %12 = vector.broadcast %cst_9 : f32 to vector<1x8xf32>
    %13 = arith.mulf %11, %12 : vector<1x8xf32>
    %14 = arith.truncf %1 : vector<8x32xf32> to vector<8x32xbf16>
    %c0_10 = arith.constant 0 : index
    %c0_11 = arith.constant 0 : index
    %15 = vector.load %arg4[%c0_10, %c0_11] : memref<32x96xbf16, #tpu.memory_space<vmem>>, vector<32x96xbf16>
    %cst_12 = arith.constant dense<0.000000e+00> : vector<8x96xf32>
    %16 = tpu.matmul %14, %15, %cst_12 {dimension_numbers = #tpu.dot_dimension_numbers<[1], [0], [0], [1], [0, 0, 1, 1], [], []>} : vector<8x32xbf16>, vector<32x96xbf16>, vector<8x96xf32> -> vector<8x96xf32>
    %c0_13 = arith.constant 0 : index
    %c0_14 = arith.constant 0 : index
    %17 = vector.load %arg5[%c0_13, %c0_14] : memref<1x96xf32, #tpu.memory_space<vmem>>, vector<1x96xf32>
    %18 = vector.broadcast %17 : vector<1x96xf32> to vector<8x96xf32>
    %19 = arith.addf %16, %18 : vector<8x96xf32>
    %20 = vector.extract_strided_slice %19 {offsets = [0, 0], sizes = [8, 32], strides = [1, 1]} : vector<8x96xf32> to vector<8x32xf32>
    %21 = arith.truncf %20 : vector<8x32xf32> to vector<8x32xbf16>
    %22 = vector.extract_strided_slice %19 {offsets = [0, 32], sizes = [8, 32], strides = [1, 1]} : vector<8x96xf32> to vector<8x32xf32>
    %23 = arith.truncf %22 : vector<8x32xf32> to vector<8x32xbf16>
    %24 = vector.extract_strided_slice %19 {offsets = [0, 64], sizes = [8, 32], strides = [1, 1]} : vector<8x96xf32> to vector<8x32xf32>
    %25 = arith.truncf %24 : vector<8x32xf32> to vector<8x32xbf16>
    %26 = vector.extract_strided_slice %21 {offsets = [0, 0], sizes = [8, 8], strides = [1, 1]} : vector<8x32xbf16> to vector<8x8xbf16>
    %27 = vector.extract_strided_slice %23 {offsets = [0, 0], sizes = [8, 8], strides = [1, 1]} : vector<8x32xbf16> to vector<8x8xbf16>
    %28 = vector.extract_strided_slice %25 {offsets = [0, 0], sizes = [8, 8], strides = [1, 1]} : vector<8x32xbf16> to vector<8x8xbf16>
    %cst_15 = arith.constant dense<0.000000e+00> : vector<8x8xf32>
    %29 = tpu.matmul %26, %27, %cst_15 {dimension_numbers = #tpu.dot_dimension_numbers<[1], [1], [0], [0], [0, 0, 1, 0], [], []>} : vector<8x8xbf16>, vector<8x8xbf16>, vector<8x8xf32> -> vector<8x8xf32>
    %cst_16 = arith.constant 0.353553385 : f32
    %30 = vector.broadcast %cst_16 : f32 to vector<8x8xf32>
    %31 = arith.mulf %29, %30 : vector<8x8xf32>
    %32 = arith.addf %31, %9 : vector<8x8xf32>
    %cst_17 = arith.constant dense<0xFF800000> : vector<8xf32>
    %33 = vector.multi_reduction <maximumf>, %32, %cst_17 [1] : vector<8x8xf32> to vector<8xf32>
    %34 = vector.shape_cast %33 : vector<8xf32> to vector<8x1xf32>
    %35 = vector.broadcast %34 : vector<8x1xf32> to vector<8x8xf32>
    %36 = arith.subf %32, %35 : vector<8x8xf32>
    %37 = math.exp %36 : vector<8x8xf32>
    %cst_18 = arith.constant dense<0.000000e+00> : vector<8xf32>
    %38 = vector.multi_reduction <add>, %37, %cst_18 [1] : vector<8x8xf32> to vector<8xf32>
    %39 = vector.shape_cast %38 : vector<8xf32> to vector<8x1xf32>
    %40 = tpu.reciprocal %39 {approx = true} : vector<8x1xf32> -> vector<8x1xf32>
    %41 = vector.broadcast %40 : vector<8x1xf32> to vector<8x8xf32>
    %42 = arith.mulf %37, %41 : vector<8x8xf32>
    %43 = arith.truncf %42 : vector<8x8xf32> to vector<8x8xbf16>
    %cst_19 = arith.constant dense<0.000000e+00> : vector<8x8xf32>
    %44 = tpu.matmul %43, %28, %cst_19 {dimension_numbers = #tpu.dot_dimension_numbers<[1], [0], [0], [1], [0, 0, 1, 1], [], []>} : vector<8x8xbf16>, vector<8x8xbf16>, vector<8x8xf32> -> vector<8x8xf32>
    %45 = arith.truncf %44 : vector<8x8xf32> to vector<8x8xbf16>
    %c0_20 = arith.constant 0 : index
    %c0_21 = arith.constant 0 : index
    %c0_22 = arith.constant 0 : index
    %46 = vector.load %arg6[%c0_20, %c0_21, %c0_22] : memref<4x8x32xbf16, #tpu.memory_space<vmem>>, vector<1x8x32xbf16>
    %47 = vector.shape_cast %46 : vector<1x8x32xbf16> to vector<8x32xbf16>
    %cst_23 = arith.constant dense<0.000000e+00> : vector<8x32xf32>
    %48 = tpu.matmul %45, %47, %cst_23 {dimension_numbers = #tpu.dot_dimension_numbers<[1], [0], [0], [1], [0, 0, 1, 1], [], []>} : vector<8x8xbf16>, vector<8x32xbf16>, vector<8x32xf32> -> vector<8x32xf32>
    %49 = vector.extract_strided_slice %21 {offsets = [0, 8], sizes = [8, 8], strides = [1, 1]} : vector<8x32xbf16> to vector<8x8xbf16>
    %50 = vector.extract_strided_slice %23 {offsets = [0, 8], sizes = [8, 8], strides = [1, 1]} : vector<8x32xbf16> to vector<8x8xbf16>
    %51 = vector.extract_strided_slice %25 {offsets = [0, 8], sizes = [8, 8], strides = [1, 1]} : vector<8x32xbf16> to vector<8x8xbf16>
    %cst_24 = arith.constant dense<0.000000e+00> : vector<8x8xf32>
    %52 = tpu.matmul %49, %50, %cst_24 {dimension_numbers = #tpu.dot_dimension_numbers<[1], [1], [0], [0], [0, 0, 1, 0], [], []>} : vector<8x8xbf16>, vector<8x8xbf16>, vector<8x8xf32> -> vector<8x8xf32>
    %cst_25 = arith.constant 0.353553385 : f32
    %53 = vector.broadcast %cst_25 : f32 to vector<8x8xf32>
    %54 = arith.mulf %52, %53 : vector<8x8xf32>
    %55 = arith.addf %54, %9 : vector<8x8xf32>
    %cst_26 = arith.constant dense<0xFF800000> : vector<8xf32>
    %56 = vector.multi_reduction <maximumf>, %55, %cst_26 [1] : vector<8x8xf32> to vector<8xf32>
    %57 = vector.shape_cast %56 : vector<8xf32> to vector<8x1xf32>
    %58 = vector.broadcast %57 : vector<8x1xf32> to vector<8x8xf32>
    %59 = arith.subf %55, %58 : vector<8x8xf32>
    %60 = math.exp %59 : vector<8x8xf32>
    %cst_27 = arith.constant dense<0.000000e+00> : vector<8xf32>
    %61 = vector.multi_reduction <add>, %60, %cst_27 [1] : vector<8x8xf32> to vector<8xf32>
    %62 = vector.shape_cast %61 : vector<8xf32> to vector<8x1xf32>
    %63 = tpu.reciprocal %62 {approx = true} : vector<8x1xf32> -> vector<8x1xf32>
    %64 = vector.broadcast %63 : vector<8x1xf32> to vector<8x8xf32>
    %65 = arith.mulf %60, %64 : vector<8x8xf32>
    %66 = arith.truncf %65 : vector<8x8xf32> to vector<8x8xbf16>
    %cst_28 = arith.constant dense<0.000000e+00> : vector<8x8xf32>
    %67 = tpu.matmul %66, %51, %cst_28 {dimension_numbers = #tpu.dot_dimension_numbers<[1], [0], [0], [1], [0, 0, 1, 1], [], []>} : vector<8x8xbf16>, vector<8x8xbf16>, vector<8x8xf32> -> vector<8x8xf32>
    %68 = arith.truncf %67 : vector<8x8xf32> to vector<8x8xbf16>
    %c1 = arith.constant 1 : index
    %c0_29 = arith.constant 0 : index
    %c0_30 = arith.constant 0 : index
    %69 = vector.load %arg6[%c1, %c0_29, %c0_30] : memref<4x8x32xbf16, #tpu.memory_space<vmem>>, vector<1x8x32xbf16>
    %70 = vector.shape_cast %69 : vector<1x8x32xbf16> to vector<8x32xbf16>
    %cst_31 = arith.constant dense<0.000000e+00> : vector<8x32xf32>
    %71 = tpu.matmul %68, %70, %cst_31 {dimension_numbers = #tpu.dot_dimension_numbers<[1], [0], [0], [1], [0, 0, 1, 1], [], []>} : vector<8x8xbf16>, vector<8x32xbf16>, vector<8x32xf32> -> vector<8x32xf32>
    %72 = arith.addf %48, %71 : vector<8x32xf32>
    %73 = vector.extract_strided_slice %21 {offsets = [0, 16], sizes = [8, 8], strides = [1, 1]} : vector<8x32xbf16> to vector<8x8xbf16>
    %74 = vector.extract_strided_slice %23 {offsets = [0, 16], sizes = [8, 8], strides = [1, 1]} : vector<8x32xbf16> to vector<8x8xbf16>
    %75 = vector.extract_strided_slice %25 {offsets = [0, 16], sizes = [8, 8], strides = [1, 1]} : vector<8x32xbf16> to vector<8x8xbf16>
    %cst_32 = arith.constant dense<0.000000e+00> : vector<8x8xf32>
    %76 = tpu.matmul %73, %74, %cst_32 {dimension_numbers = #tpu.dot_dimension_numbers<[1], [1], [0], [0], [0, 0, 1, 0], [], []>} : vector<8x8xbf16>, vector<8x8xbf16>, vector<8x8xf32> -> vector<8x8xf32>
    %cst_33 = arith.constant 0.353553385 : f32
    %77 = vector.broadcast %cst_33 : f32 to vector<8x8xf32>
    %78 = arith.mulf %76, %77 : vector<8x8xf32>
    %79 = arith.addf %78, %9 : vector<8x8xf32>
    %cst_34 = arith.constant dense<0xFF800000> : vector<8xf32>
    %80 = vector.multi_reduction <maximumf>, %79, %cst_34 [1] : vector<8x8xf32> to vector<8xf32>
    %81 = vector.shape_cast %80 : vector<8xf32> to vector<8x1xf32>
    %82 = vector.broadcast %81 : vector<8x1xf32> to vector<8x8xf32>
    %83 = arith.subf %79, %82 : vector<8x8xf32>
    %84 = math.exp %83 : vector<8x8xf32>
    %cst_35 = arith.constant dense<0.000000e+00> : vector<8xf32>
    %85 = vector.multi_reduction <add>, %84, %cst_35 [1] : vector<8x8xf32> to vector<8xf32>
    %86 = vector.shape_cast %85 : vector<8xf32> to vector<8x1xf32>
    %87 = tpu.reciprocal %86 {approx = true} : vector<8x1xf32> -> vector<8x1xf32>
    %88 = vector.broadcast %87 : vector<8x1xf32> to vector<8x8xf32>
    %89 = arith.mulf %84, %88 : vector<8x8xf32>
    %90 = arith.truncf %89 : vector<8x8xf32> to vector<8x8xbf16>
    %cst_36 = arith.constant dense<0.000000e+00> : vector<8x8xf32>
    %91 = tpu.matmul %90, %75, %cst_36 {dimension_numbers = #tpu.dot_dimension_numbers<[1], [0], [0], [1], [0, 0, 1, 1], [], []>} : vector<8x8xbf16>, vector<8x8xbf16>, vector<8x8xf32> -> vector<8x8xf32>
    %92 = arith.truncf %91 : vector<8x8xf32> to vector<8x8xbf16>
    %c2 = arith.constant 2 : index
    %c0_37 = arith.constant 0 : index
    %c0_38 = arith.constant 0 : index
    %93 = vector.load %arg6[%c2, %c0_37, %c0_38] : memref<4x8x32xbf16, #tpu.memory_space<vmem>>, vector<1x8x32xbf16>
    %94 = vector.shape_cast %93 : vector<1x8x32xbf16> to vector<8x32xbf16>
    %cst_39 = arith.constant dense<0.000000e+00> : vector<8x32xf32>
    %95 = tpu.matmul %92, %94, %cst_39 {dimension_numbers = #tpu.dot_dimension_numbers<[1], [0], [0], [1], [0, 0, 1, 1], [], []>} : vector<8x8xbf16>, vector<8x32xbf16>, vector<8x32xf32> -> vector<8x32xf32>
    %96 = arith.addf %72, %95 : vector<8x32xf32>
    %97 = vector.extract_strided_slice %21 {offsets = [0, 24], sizes = [8, 8], strides = [1, 1]} : vector<8x32xbf16> to vector<8x8xbf16>
    %98 = vector.extract_strided_slice %23 {offsets = [0, 24], sizes = [8, 8], strides = [1, 1]} : vector<8x32xbf16> to vector<8x8xbf16>
    %99 = vector.extract_strided_slice %25 {offsets = [0, 24], sizes = [8, 8], strides = [1, 1]} : vector<8x32xbf16> to vector<8x8xbf16>
    %cst_40 = arith.constant dense<0.000000e+00> : vector<8x8xf32>
    %100 = tpu.matmul %97, %98, %cst_40 {dimension_numbers = #tpu.dot_dimension_numbers<[1], [1], [0], [0], [0, 0, 1, 0], [], []>} : vector<8x8xbf16>, vector<8x8xbf16>, vector<8x8xf32> -> vector<8x8xf32>
    %cst_41 = arith.constant 0.353553385 : f32
    %101 = vector.broadcast %cst_41 : f32 to vector<8x8xf32>
    %102 = arith.mulf %100, %101 : vector<8x8xf32>
    %103 = arith.addf %102, %9 : vector<8x8xf32>
    %cst_42 = arith.constant dense<0xFF800000> : vector<8xf32>
    %104 = vector.multi_reduction <maximumf>, %103, %cst_42 [1] : vector<8x8xf32> to vector<8xf32>
    %105 = vector.shape_cast %104 : vector<8xf32> to vector<8x1xf32>
    %106 = vector.broadcast %105 : vector<8x1xf32> to vector<8x8xf32>
    %107 = arith.subf %103, %106 : vector<8x8xf32>
    %108 = math.exp %107 : vector<8x8xf32>
    %cst_43 = arith.constant dense<0.000000e+00> : vector<8xf32>
    %109 = vector.multi_reduction <add>, %108, %cst_43 [1] : vector<8x8xf32> to vector<8xf32>
    %110 = vector.shape_cast %109 : vector<8xf32> to vector<8x1xf32>
    %111 = tpu.reciprocal %110 {approx = true} : vector<8x1xf32> -> vector<8x1xf32>
    %112 = vector.broadcast %111 : vector<8x1xf32> to vector<8x8xf32>
    %113 = arith.mulf %108, %112 : vector<8x8xf32>
    %114 = arith.truncf %113 : vector<8x8xf32> to vector<8x8xbf16>
    %cst_44 = arith.constant dense<0.000000e+00> : vector<8x8xf32>
    %115 = tpu.matmul %114, %99, %cst_44 {dimension_numbers = #tpu.dot_dimension_numbers<[1], [0], [0], [1], [0, 0, 1, 1], [], []>} : vector<8x8xbf16>, vector<8x8xbf16>, vector<8x8xf32> -> vector<8x8xf32>
    %116 = arith.truncf %115 : vector<8x8xf32> to vector<8x8xbf16>
    %c3 = arith.constant 3 : index
    %c0_45 = arith.constant 0 : index
    %c0_46 = arith.constant 0 : index
    %117 = vector.load %arg6[%c3, %c0_45, %c0_46] : memref<4x8x32xbf16, #tpu.memory_space<vmem>>, vector<1x8x32xbf16>
    %118 = vector.shape_cast %117 : vector<1x8x32xbf16> to vector<8x32xbf16>
    %cst_47 = arith.constant dense<0.000000e+00> : vector<8x32xf32>
    %119 = tpu.matmul %116, %118, %cst_47 {dimension_numbers = #tpu.dot_dimension_numbers<[1], [0], [0], [1], [0, 0, 1, 1], [], []>} : vector<8x8xbf16>, vector<8x32xbf16>, vector<8x32xf32> -> vector<8x32xf32>
    %120 = arith.addf %96, %119 : vector<8x32xf32>
    %c0_48 = arith.constant 0 : index
    %c0_49 = arith.constant 0 : index
    %121 = vector.load %arg7[%c0_48, %c0_49] : memref<1x32xf32, #tpu.memory_space<vmem>>, vector<1x32xf32>
    %122 = vector.broadcast %121 : vector<1x32xf32> to vector<8x32xf32>
    %123 = arith.addf %120, %122 : vector<8x32xf32>
    %c0_50 = arith.constant 0 : index
    %c0_51 = arith.constant 0 : index
    %124 = vector.load %arg8[%c0_50, %c0_51] : memref<1x32xf32, #tpu.memory_space<vmem>>, vector<1x32xf32>
    %c0_52 = arith.constant 0 : index
    %c0_53 = arith.constant 0 : index
    %125 = vector.load %arg9[%c0_52, %c0_53] : memref<1x32xf32, #tpu.memory_space<vmem>>, vector<1x32xf32>
    %126 = arith.addf %1, %123 : vector<8x32xf32>
    %cst_54 = arith.constant dense<0.000000e+00> : vector<8xf32>
    %127 = vector.multi_reduction <add>, %126, %cst_54 [1] : vector<8x32xf32> to vector<8xf32>
    %128 = vector.shape_cast %127 : vector<8xf32> to vector<8x1xf32>
    %cst_55 = arith.constant 3.200000e+01 : f32
    %129 = vector.broadcast %cst_55 : f32 to vector<8x1xf32>
    %130 = arith.divf %128, %129 : vector<8x1xf32>
    %131 = vector.broadcast %130 : vector<8x1xf32> to vector<8x32xf32>
    %132 = arith.subf %126, %131 : vector<8x32xf32>
    %133 = arith.mulf %132, %132 : vector<8x32xf32>
    %cst_56 = arith.constant dense<0.000000e+00> : vector<8xf32>
    %134 = vector.multi_reduction <add>, %133, %cst_56 [1] : vector<8x32xf32> to vector<8xf32>
    %135 = vector.shape_cast %134 : vector<8xf32> to vector<8x1xf32>
    %cst_57 = arith.constant 3.200000e+01 : f32
    %136 = vector.broadcast %cst_57 : f32 to vector<8x1xf32>
    %137 = arith.divf %135, %136 : vector<8x1xf32>
    %cst_58 = arith.constant 9.99999974E-6 : f32
    %138 = vector.broadcast %cst_58 : f32 to vector<8x1xf32>
    %139 = arith.addf %137, %138 : vector<8x1xf32>
    %140 = math.rsqrt %139 : vector<8x1xf32>
    %141 = vector.broadcast %140 : vector<8x1xf32> to vector<8x32xf32>
    %142 = arith.mulf %132, %141 : vector<8x32xf32>
    %143 = vector.broadcast %124 : vector<1x32xf32> to vector<8x32xf32>
    %144 = arith.mulf %142, %143 : vector<8x32xf32>
    %145 = vector.broadcast %125 : vector<1x32xf32> to vector<8x32xf32>
    %146 = arith.addf %144, %145 : vector<8x32xf32>
    %147 = arith.truncf %146 : vector<8x32xf32> to vector<8x32xbf16>
    %c0_59 = arith.constant 0 : index
    %c0_60 = arith.constant 0 : index
    %148 = vector.load %arg10[%c0_59, %c0_60] : memref<32x32xbf16, #tpu.memory_space<vmem>>, vector<32x32xbf16>
    %cst_61 = arith.constant dense<0.000000e+00> : vector<8x32xf32>
    %149 = tpu.matmul %147, %148, %cst_61 {dimension_numbers = #tpu.dot_dimension_numbers<[1], [0], [0], [1], [0, 0, 1, 1], [], []>} : vector<8x32xbf16>, vector<32x32xbf16>, vector<8x32xf32> -> vector<8x32xf32>
    %c0_62 = arith.constant 0 : index
    %c0_63 = arith.constant 0 : index
    %150 = vector.load %arg11[%c0_62, %c0_63] : memref<1x32xf32, #tpu.memory_space<vmem>>, vector<1x32xf32>
    %151 = vector.broadcast %150 : vector<1x32xf32> to vector<8x32xf32>
    %152 = arith.addf %149, %151 : vector<8x32xf32>
    %153 = arith.truncf %152 : vector<8x32xf32> to vector<8x32xbf16>
    %154 = arith.truncf %3 : vector<8x32xf32> to vector<8x32xbf16>
    %c0_64 = arith.constant 0 : index
    %c0_65 = arith.constant 0 : index
    %155 = vector.load %arg12[%c0_64, %c0_65] : memref<32x64xbf16, #tpu.memory_space<vmem>>, vector<32x64xbf16>
    %cst_66 = arith.constant dense<0.000000e+00> : vector<8x64xf32>
    %156 = tpu.matmul %154, %155, %cst_66 {dimension_numbers = #tpu.dot_dimension_numbers<[1], [0], [0], [1], [0, 0, 1, 1], [], []>} : vector<8x32xbf16>, vector<32x64xbf16>, vector<8x64xf32> -> vector<8x64xf32>
    %c0_67 = arith.constant 0 : index
    %c0_68 = arith.constant 0 : index
    %157 = vector.load %arg13[%c0_67, %c0_68] : memref<1x64xf32, #tpu.memory_space<vmem>>, vector<1x64xf32>
    %158 = vector.broadcast %157 : vector<1x64xf32> to vector<8x64xf32>
    %159 = arith.addf %156, %158 : vector<8x64xf32>
    %160 = vector.extract_strided_slice %159 {offsets = [0, 0], sizes = [8, 32], strides = [1, 1]} : vector<8x64xf32> to vector<8x32xf32>
    %161 = arith.truncf %160 : vector<8x32xf32> to vector<8x32xbf16>
    %162 = vector.extract_strided_slice %159 {offsets = [0, 32], sizes = [8, 32], strides = [1, 1]} : vector<8x64xf32> to vector<8x32xf32>
    %163 = arith.truncf %162 : vector<8x32xf32> to vector<8x32xbf16>
    %164 = vector.extract_strided_slice %153 {offsets = [0, 0], sizes = [8, 8], strides = [1, 1]} : vector<8x32xbf16> to vector<8x8xbf16>
    %165 = vector.extract_strided_slice %161 {offsets = [0, 0], sizes = [8, 8], strides = [1, 1]} : vector<8x32xbf16> to vector<8x8xbf16>
    %166 = vector.extract_strided_slice %163 {offsets = [0, 0], sizes = [8, 8], strides = [1, 1]} : vector<8x32xbf16> to vector<8x8xbf16>
    %cst_69 = arith.constant dense<0.000000e+00> : vector<8x8xf32>
    %167 = tpu.matmul %164, %165, %cst_69 {dimension_numbers = #tpu.dot_dimension_numbers<[1], [1], [0], [0], [0, 0, 1, 0], [], []>} : vector<8x8xbf16>, vector<8x8xbf16>, vector<8x8xf32> -> vector<8x8xf32>
    %cst_70 = arith.constant 0.353553385 : f32
    %168 = vector.broadcast %cst_70 : f32 to vector<8x8xf32>
    %169 = arith.mulf %167, %168 : vector<8x8xf32>
    %170 = vector.broadcast %13 : vector<1x8xf32> to vector<8x8xf32>
    %171 = arith.addf %169, %170 : vector<8x8xf32>
    %cst_71 = arith.constant dense<0xFF800000> : vector<8xf32>
    %172 = vector.multi_reduction <maximumf>, %171, %cst_71 [1] : vector<8x8xf32> to vector<8xf32>
    %173 = vector.shape_cast %172 : vector<8xf32> to vector<8x1xf32>
    %174 = vector.broadcast %173 : vector<8x1xf32> to vector<8x8xf32>
    %175 = arith.subf %171, %174 : vector<8x8xf32>
    %176 = math.exp %175 : vector<8x8xf32>
    %cst_72 = arith.constant dense<0.000000e+00> : vector<8xf32>
    %177 = vector.multi_reduction <add>, %176, %cst_72 [1] : vector<8x8xf32> to vector<8xf32>
    %178 = vector.shape_cast %177 : vector<8xf32> to vector<8x1xf32>
    %179 = tpu.reciprocal %178 {approx = true} : vector<8x1xf32> -> vector<8x1xf32>
    %180 = vector.broadcast %179 : vector<8x1xf32> to vector<8x8xf32>
    %181 = arith.mulf %176, %180 : vector<8x8xf32>
    %182 = arith.truncf %181 : vector<8x8xf32> to vector<8x8xbf16>
    %cst_73 = arith.constant dense<0.000000e+00> : vector<8x8xf32>
    %183 = tpu.matmul %182, %166, %cst_73 {dimension_numbers = #tpu.dot_dimension_numbers<[1], [0], [0], [1], [0, 0, 1, 1], [], []>} : vector<8x8xbf16>, vector<8x8xbf16>, vector<8x8xf32> -> vector<8x8xf32>
    %184 = arith.truncf %183 : vector<8x8xf32> to vector<8x8xbf16>
    %c0_74 = arith.constant 0 : index
    %c0_75 = arith.constant 0 : index
    %c0_76 = arith.constant 0 : index
    %185 = vector.load %arg14[%c0_74, %c0_75, %c0_76] : memref<4x8x32xbf16, #tpu.memory_space<vmem>>, vector<1x8x32xbf16>
    %186 = vector.shape_cast %185 : vector<1x8x32xbf16> to vector<8x32xbf16>
    %cst_77 = arith.constant dense<0.000000e+00> : vector<8x32xf32>
    %187 = tpu.matmul %184, %186, %cst_77 {dimension_numbers = #tpu.dot_dimension_numbers<[1], [0], [0], [1], [0, 0, 1, 1], [], []>} : vector<8x8xbf16>, vector<8x32xbf16>, vector<8x32xf32> -> vector<8x32xf32>
    %188 = vector.extract_strided_slice %153 {offsets = [0, 8], sizes = [8, 8], strides = [1, 1]} : vector<8x32xbf16> to vector<8x8xbf16>
    %189 = vector.extract_strided_slice %161 {offsets = [0, 8], sizes = [8, 8], strides = [1, 1]} : vector<8x32xbf16> to vector<8x8xbf16>
    %190 = vector.extract_strided_slice %163 {offsets = [0, 8], sizes = [8, 8], strides = [1, 1]} : vector<8x32xbf16> to vector<8x8xbf16>
    %cst_78 = arith.constant dense<0.000000e+00> : vector<8x8xf32>
    %191 = tpu.matmul %188, %189, %cst_78 {dimension_numbers = #tpu.dot_dimension_numbers<[1], [1], [0], [0], [0, 0, 1, 0], [], []>} : vector<8x8xbf16>, vector<8x8xbf16>, vector<8x8xf32> -> vector<8x8xf32>
    %cst_79 = arith.constant 0.353553385 : f32
    %192 = vector.broadcast %cst_79 : f32 to vector<8x8xf32>
    %193 = arith.mulf %191, %192 : vector<8x8xf32>
    %194 = vector.broadcast %13 : vector<1x8xf32> to vector<8x8xf32>
    %195 = arith.addf %193, %194 : vector<8x8xf32>
    %cst_80 = arith.constant dense<0xFF800000> : vector<8xf32>
    %196 = vector.multi_reduction <maximumf>, %195, %cst_80 [1] : vector<8x8xf32> to vector<8xf32>
    %197 = vector.shape_cast %196 : vector<8xf32> to vector<8x1xf32>
    %198 = vector.broadcast %197 : vector<8x1xf32> to vector<8x8xf32>
    %199 = arith.subf %195, %198 : vector<8x8xf32>
    %200 = math.exp %199 : vector<8x8xf32>
    %cst_81 = arith.constant dense<0.000000e+00> : vector<8xf32>
    %201 = vector.multi_reduction <add>, %200, %cst_81 [1] : vector<8x8xf32> to vector<8xf32>
    %202 = vector.shape_cast %201 : vector<8xf32> to vector<8x1xf32>
    %203 = tpu.reciprocal %202 {approx = true} : vector<8x1xf32> -> vector<8x1xf32>
    %204 = vector.broadcast %203 : vector<8x1xf32> to vector<8x8xf32>
    %205 = arith.mulf %200, %204 : vector<8x8xf32>
    %206 = arith.truncf %205 : vector<8x8xf32> to vector<8x8xbf16>
    %cst_82 = arith.constant dense<0.000000e+00> : vector<8x8xf32>
    %207 = tpu.matmul %206, %190, %cst_82 {dimension_numbers = #tpu.dot_dimension_numbers<[1], [0], [0], [1], [0, 0, 1, 1], [], []>} : vector<8x8xbf16>, vector<8x8xbf16>, vector<8x8xf32> -> vector<8x8xf32>
    %208 = arith.truncf %207 : vector<8x8xf32> to vector<8x8xbf16>
    %c1_83 = arith.constant 1 : index
    %c0_84 = arith.constant 0 : index
    %c0_85 = arith.constant 0 : index
    %209 = vector.load %arg14[%c1_83, %c0_84, %c0_85] : memref<4x8x32xbf16, #tpu.memory_space<vmem>>, vector<1x8x32xbf16>
    %210 = vector.shape_cast %209 : vector<1x8x32xbf16> to vector<8x32xbf16>
    %cst_86 = arith.constant dense<0.000000e+00> : vector<8x32xf32>
    %211 = tpu.matmul %208, %210, %cst_86 {dimension_numbers = #tpu.dot_dimension_numbers<[1], [0], [0], [1], [0, 0, 1, 1], [], []>} : vector<8x8xbf16>, vector<8x32xbf16>, vector<8x32xf32> -> vector<8x32xf32>
    %212 = arith.addf %187, %211 : vector<8x32xf32>
    %213 = vector.extract_strided_slice %153 {offsets = [0, 16], sizes = [8, 8], strides = [1, 1]} : vector<8x32xbf16> to vector<8x8xbf16>
    %214 = vector.extract_strided_slice %161 {offsets = [0, 16], sizes = [8, 8], strides = [1, 1]} : vector<8x32xbf16> to vector<8x8xbf16>
    %215 = vector.extract_strided_slice %163 {offsets = [0, 16], sizes = [8, 8], strides = [1, 1]} : vector<8x32xbf16> to vector<8x8xbf16>
    %cst_87 = arith.constant dense<0.000000e+00> : vector<8x8xf32>
    %216 = tpu.matmul %213, %214, %cst_87 {dimension_numbers = #tpu.dot_dimension_numbers<[1], [1], [0], [0], [0, 0, 1, 0], [], []>} : vector<8x8xbf16>, vector<8x8xbf16>, vector<8x8xf32> -> vector<8x8xf32>
    %cst_88 = arith.constant 0.353553385 : f32
    %217 = vector.broadcast %cst_88 : f32 to vector<8x8xf32>
    %218 = arith.mulf %216, %217 : vector<8x8xf32>
    %219 = vector.broadcast %13 : vector<1x8xf32> to vector<8x8xf32>
    %220 = arith.addf %218, %219 : vector<8x8xf32>
    %cst_89 = arith.constant dense<0xFF800000> : vector<8xf32>
    %221 = vector.multi_reduction <maximumf>, %220, %cst_89 [1] : vector<8x8xf32> to vector<8xf32>
    %222 = vector.shape_cast %221 : vector<8xf32> to vector<8x1xf32>
    %223 = vector.broadcast %222 : vector<8x1xf32> to vector<8x8xf32>
    %224 = arith.subf %220, %223 : vector<8x8xf32>
    %225 = math.exp %224 : vector<8x8xf32>
    %cst_90 = arith.constant dense<0.000000e+00> : vector<8xf32>
    %226 = vector.multi_reduction <add>, %225, %cst_90 [1] : vector<8x8xf32> to vector<8xf32>
    %227 = vector.shape_cast %226 : vector<8xf32> to vector<8x1xf32>
    %228 = tpu.reciprocal %227 {approx = true} : vector<8x1xf32> -> vector<8x1xf32>
    %229 = vector.broadcast %228 : vector<8x1xf32> to vector<8x8xf32>
    %230 = arith.mulf %225, %229 : vector<8x8xf32>
    %231 = arith.truncf %230 : vector<8x8xf32> to vector<8x8xbf16>
    %cst_91 = arith.constant dense<0.000000e+00> : vector<8x8xf32>
    %232 = tpu.matmul %231, %215, %cst_91 {dimension_numbers = #tpu.dot_dimension_numbers<[1], [0], [0], [1], [0, 0, 1, 1], [], []>} : vector<8x8xbf16>, vector<8x8xbf16>, vector<8x8xf32> -> vector<8x8xf32>
    %233 = arith.truncf %232 : vector<8x8xf32> to vector<8x8xbf16>
    %c2_92 = arith.constant 2 : index
    %c0_93 = arith.constant 0 : index
    %c0_94 = arith.constant 0 : index
    %234 = vector.load %arg14[%c2_92, %c0_93, %c0_94] : memref<4x8x32xbf16, #tpu.memory_space<vmem>>, vector<1x8x32xbf16>
    %235 = vector.shape_cast %234 : vector<1x8x32xbf16> to vector<8x32xbf16>
    %cst_95 = arith.constant dense<0.000000e+00> : vector<8x32xf32>
    %236 = tpu.matmul %233, %235, %cst_95 {dimension_numbers = #tpu.dot_dimension_numbers<[1], [0], [0], [1], [0, 0, 1, 1], [], []>} : vector<8x8xbf16>, vector<8x32xbf16>, vector<8x32xf32> -> vector<8x32xf32>
    %237 = arith.addf %212, %236 : vector<8x32xf32>
    %238 = vector.extract_strided_slice %153 {offsets = [0, 24], sizes = [8, 8], strides = [1, 1]} : vector<8x32xbf16> to vector<8x8xbf16>
    %239 = vector.extract_strided_slice %161 {offsets = [0, 24], sizes = [8, 8], strides = [1, 1]} : vector<8x32xbf16> to vector<8x8xbf16>
    %240 = vector.extract_strided_slice %163 {offsets = [0, 24], sizes = [8, 8], strides = [1, 1]} : vector<8x32xbf16> to vector<8x8xbf16>
    %cst_96 = arith.constant dense<0.000000e+00> : vector<8x8xf32>
    %241 = tpu.matmul %238, %239, %cst_96 {dimension_numbers = #tpu.dot_dimension_numbers<[1], [1], [0], [0], [0, 0, 1, 0], [], []>} : vector<8x8xbf16>, vector<8x8xbf16>, vector<8x8xf32> -> vector<8x8xf32>
    %cst_97 = arith.constant 0.353553385 : f32
    %242 = vector.broadcast %cst_97 : f32 to vector<8x8xf32>
    %243 = arith.mulf %241, %242 : vector<8x8xf32>
    %244 = vector.broadcast %13 : vector<1x8xf32> to vector<8x8xf32>
    %245 = arith.addf %243, %244 : vector<8x8xf32>
    %cst_98 = arith.constant dense<0xFF800000> : vector<8xf32>
    %246 = vector.multi_reduction <maximumf>, %245, %cst_98 [1] : vector<8x8xf32> to vector<8xf32>
    %247 = vector.shape_cast %246 : vector<8xf32> to vector<8x1xf32>
    %248 = vector.broadcast %247 : vector<8x1xf32> to vector<8x8xf32>
    %249 = arith.subf %245, %248 : vector<8x8xf32>
    %250 = math.exp %249 : vector<8x8xf32>
    %cst_99 = arith.constant dense<0.000000e+00> : vector<8xf32>
    %251 = vector.multi_reduction <add>, %250, %cst_99 [1] : vector<8x8xf32> to vector<8xf32>
    %252 = vector.shape_cast %251 : vector<8xf32> to vector<8x1xf32>
    %253 = tpu.reciprocal %252 {approx = true} : vector<8x1xf32> -> vector<8x1xf32>
    %254 = vector.broadcast %253 : vector<8x1xf32> to vector<8x8xf32>
    %255 = arith.mulf %250, %254 : vector<8x8xf32>
    %256 = arith.truncf %255 : vector<8x8xf32> to vector<8x8xbf16>
    %cst_100 = arith.constant dense<0.000000e+00> : vector<8x8xf32>
    %257 = tpu.matmul %256, %240, %cst_100 {dimension_numbers = #tpu.dot_dimension_numbers<[1], [0], [0], [1], [0, 0, 1, 1], [], []>} : vector<8x8xbf16>, vector<8x8xbf16>, vector<8x8xf32> -> vector<8x8xf32>
    %258 = arith.truncf %257 : vector<8x8xf32> to vector<8x8xbf16>
    %c3_101 = arith.constant 3 : index
    %c0_102 = arith.constant 0 : index
    %c0_103 = arith.constant 0 : index
    %259 = vector.load %arg14[%c3_101, %c0_102, %c0_103] : memref<4x8x32xbf16, #tpu.memory_space<vmem>>, vector<1x8x32xbf16>
    %260 = vector.shape_cast %259 : vector<1x8x32xbf16> to vector<8x32xbf16>
    %cst_104 = arith.constant dense<0.000000e+00> : vector<8x32xf32>
    %261 = tpu.matmul %258, %260, %cst_104 {dimension_numbers = #tpu.dot_dimension_numbers<[1], [0], [0], [1], [0, 0, 1, 1], [], []>} : vector<8x8xbf16>, vector<8x32xbf16>, vector<8x32xf32> -> vector<8x32xf32>
    %262 = arith.addf %237, %261 : vector<8x32xf32>
    %c0_105 = arith.constant 0 : index
    %c0_106 = arith.constant 0 : index
    %263 = vector.load %arg15[%c0_105, %c0_106] : memref<1x32xf32, #tpu.memory_space<vmem>>, vector<1x32xf32>
    %264 = vector.broadcast %263 : vector<1x32xf32> to vector<8x32xf32>
    %265 = arith.addf %262, %264 : vector<8x32xf32>
    %c0_107 = arith.constant 0 : index
    %c0_108 = arith.constant 0 : index
    %266 = vector.load %arg16[%c0_107, %c0_108] : memref<1x32xf32, #tpu.memory_space<vmem>>, vector<1x32xf32>
    %c0_109 = arith.constant 0 : index
    %c0_110 = arith.constant 0 : index
    %267 = vector.load %arg17[%c0_109, %c0_110] : memref<1x32xf32, #tpu.memory_space<vmem>>, vector<1x32xf32>
    %268 = arith.addf %146, %265 : vector<8x32xf32>
    %cst_111 = arith.constant dense<0.000000e+00> : vector<8xf32>
    %269 = vector.multi_reduction <add>, %268, %cst_111 [1] : vector<8x32xf32> to vector<8xf32>
    %270 = vector.shape_cast %269 : vector<8xf32> to vector<8x1xf32>
    %cst_112 = arith.constant 3.200000e+01 : f32
    %271 = vector.broadcast %cst_112 : f32 to vector<8x1xf32>
    %272 = arith.divf %270, %271 : vector<8x1xf32>
    %273 = vector.broadcast %272 : vector<8x1xf32> to vector<8x32xf32>
    %274 = arith.subf %268, %273 : vector<8x32xf32>
    %275 = arith.mulf %274, %274 : vector<8x32xf32>
    %cst_113 = arith.constant dense<0.000000e+00> : vector<8xf32>
    %276 = vector.multi_reduction <add>, %275, %cst_113 [1] : vector<8x32xf32> to vector<8xf32>
    %277 = vector.shape_cast %276 : vector<8xf32> to vector<8x1xf32>
    %cst_114 = arith.constant 3.200000e+01 : f32
    %278 = vector.broadcast %cst_114 : f32 to vector<8x1xf32>
    %279 = arith.divf %277, %278 : vector<8x1xf32>
    %cst_115 = arith.constant 9.99999974E-6 : f32
    %280 = vector.broadcast %cst_115 : f32 to vector<8x1xf32>
    %281 = arith.addf %279, %280 : vector<8x1xf32>
    %282 = math.rsqrt %281 : vector<8x1xf32>
    %283 = vector.broadcast %282 : vector<8x1xf32> to vector<8x32xf32>
    %284 = arith.mulf %274, %283 : vector<8x32xf32>
    %285 = vector.broadcast %266 : vector<1x32xf32> to vector<8x32xf32>
    %286 = arith.mulf %284, %285 : vector<8x32xf32>
    %287 = vector.broadcast %267 : vector<1x32xf32> to vector<8x32xf32>
    %288 = arith.addf %286, %287 : vector<8x32xf32>
    %289 = arith.truncf %288 : vector<8x32xf32> to vector<8x32xbf16>
    %c0_116 = arith.constant 0 : index
    %c0_117 = arith.constant 0 : index
    %290 = vector.load %arg18[%c0_116, %c0_117] : memref<32x64xbf16, #tpu.memory_space<vmem>>, vector<32x64xbf16>
    %cst_118 = arith.constant dense<0.000000e+00> : vector<8x64xf32>
    %291 = tpu.matmul %289, %290, %cst_118 {dimension_numbers = #tpu.dot_dimension_numbers<[1], [0], [0], [1], [0, 0, 1, 1], [], []>} : vector<8x32xbf16>, vector<32x64xbf16>, vector<8x64xf32> -> vector<8x64xf32>
    %c0_119 = arith.constant 0 : index
    %c0_120 = arith.constant 0 : index
    %292 = vector.load %arg19[%c0_119, %c0_120] : memref<1x64xf32, #tpu.memory_space<vmem>>, vector<1x64xf32>
    %293 = vector.broadcast %292 : vector<1x64xf32> to vector<8x64xf32>
    %294 = arith.addf %291, %293 : vector<8x64xf32>
    %cst_121 = arith.constant 0.000000e+00 : f32
    %295 = vector.broadcast %cst_121 : f32 to vector<8x64xf32>
    %296 = arith.maximumf %294, %295 : vector<8x64xf32>
    %297 = arith.truncf %296 : vector<8x64xf32> to vector<8x64xbf16>
    %c0_122 = arith.constant 0 : index
    %c0_123 = arith.constant 0 : index
    %298 = vector.load %arg20[%c0_122, %c0_123] : memref<64x32xbf16, #tpu.memory_space<vmem>>, vector<64x32xbf16>
    %cst_124 = arith.constant dense<0.000000e+00> : vector<8x32xf32>
    %299 = tpu.matmul %297, %298, %cst_124 {dimension_numbers = #tpu.dot_dimension_numbers<[1], [0], [0], [1], [0, 0, 1, 1], [], []>} : vector<8x64xbf16>, vector<64x32xbf16>, vector<8x32xf32> -> vector<8x32xf32>
    %c0_125 = arith.constant 0 : index
    %c0_126 = arith.constant 0 : index
    %300 = vector.load %arg21[%c0_125, %c0_126] : memref<1x32xf32, #tpu.memory_space<vmem>>, vector<1x32xf32>
    %301 = vector.broadcast %300 : vector<1x32xf32> to vector<8x32xf32>
    %302 = arith.addf %299, %301 : vector<8x32xf32>
    %c0_127 = arith.constant 0 : index
    %c0_128 = arith.constant 0 : index
    %303 = vector.load %arg22[%c0_127, %c0_128] : memref<1x32xf32, #tpu.memory_space<vmem>>, vector<1x32xf32>
    %c0_129 = arith.constant 0 : index
    %c0_130 = arith.constant 0 : index
    %304 = vector.load %arg23[%c0_129, %c0_130] : memref<1x32xf32, #tpu.memory_space<vmem>>, vector<1x32xf32>
    %305 = arith.addf %288, %302 : vector<8x32xf32>
    %cst_131 = arith.constant dense<0.000000e+00> : vector<8xf32>
    %306 = vector.multi_reduction <add>, %305, %cst_131 [1] : vector<8x32xf32> to vector<8xf32>
    %307 = vector.shape_cast %306 : vector<8xf32> to vector<8x1xf32>
    %cst_132 = arith.constant 3.200000e+01 : f32
    %308 = vector.broadcast %cst_132 : f32 to vector<8x1xf32>
    %309 = arith.divf %307, %308 : vector<8x1xf32>
    %310 = vector.broadcast %309 : vector<8x1xf32> to vector<8x32xf32>
    %311 = arith.subf %305, %310 : vector<8x32xf32>
    %312 = arith.mulf %311, %311 : vector<8x32xf32>
    %cst_133 = arith.constant dense<0.000000e+00> : vector<8xf32>
    %313 = vector.multi_reduction <add>, %312, %cst_133 [1] : vector<8x32xf32> to vector<8xf32>
    %314 = vector.shape_cast %313 : vector<8xf32> to vector<8x1xf32>
    %cst_134 = arith.constant 3.200000e+01 : f32
    %315 = vector.broadcast %cst_134 : f32 to vector<8x1xf32>
    %316 = arith.divf %314, %315 : vector<8x1xf32>
    %cst_135 = arith.constant 9.99999974E-6 : f32
    %317 = vector.broadcast %cst_135 : f32 to vector<8x1xf32>
    %318 = arith.addf %316, %317 : vector<8x1xf32>
    %319 = math.rsqrt %318 : vector<8x1xf32>
    %320 = vector.broadcast %319 : vector<8x1xf32> to vector<8x32xf32>
    %321 = arith.mulf %311, %320 : vector<8x32xf32>
    %322 = vector.broadcast %303 : vector<1x32xf32> to vector<8x32xf32>
    %323 = arith.mulf %321, %322 : vector<8x32xf32>
    %324 = vector.broadcast %304 : vector<1x32xf32> to vector<8x32xf32>
    %325 = arith.addf %323, %324 : vector<8x32xf32>
    %c0_136 = arith.constant 0 : index
    %c0_137 = arith.constant 0 : index
    %c0_138 = arith.constant 0 : index
    %326 = vector.load %arg24[%c0_136, %c0_137, %c0_138] : memref<1x8x32xf32, #tpu.memory_space<vmem>>, vector<1x8x32xf32>
    %327 = vector.shape_cast %326 : vector<1x8x32xf32> to vector<8x32xf32>
    %328 = vector.shape_cast %325 : vector<8x32xf32> to vector<1x8x32xf32>
    tpu.vector_store %arg24[%c0_136, %c0_137, %c0_138], %328 {strides = array<i32>} : memref<1x8x32xf32, #tpu.memory_space<vmem>>, vector<1x8x32xf32>,
    return
  }
  func.func @transform_0(%arg0: i32) -> (i32, i32, i32) {
    %c0_i32 = arith.constant 0 : i32
    %c0_i32_0 = arith.constant 0 : i32
    %c0_i32_1 = arith.constant 0 : i32
    return %arg0, %c0_i32, %c0_i32_0 : i32, i32, i32
  }
  func.func @transform_1(%arg0: i32) -> (i32, i32, i32) {
    %c0_i32 = arith.constant 0 : i32
    %c0_i32_0 = arith.constant 0 : i32
    %c0_i32_1 = arith.constant 0 : i32
    return %arg0, %c0_i32, %c0_i32_0 : i32, i32, i32
  }
  func.func @transform_2(%arg0: i32) -> (i32, i32, i32) {
    %c0_i32 = arith.constant 0 : i32
    %c0_i32_0 = arith.constant 0 : i32
    %c0_i32_1 = arith.constant 0 : i32
    return %arg0, %c0_i32, %c0_i32_0 : i32, i32, i32
  }
  func.func @transform_3(%arg0: i32) -> (i32, i32) {
    %c0_i32 = arith.constant 0 : i32
    %c0_i32_0 = arith.constant 0 : i32
    %c0_i32_1 = arith.constant 0 : i32
    return %c0_i32, %c0_i32_0 : i32, i32
  }
  func.func @transform_4(%arg0: i32) -> (i32, i32) {
    %c0_i32 = arith.constant 0 : i32
    %c0_i32_0 = arith.constant 0 : i32
    %c0_i32_1 = arith.constant 0 : i32
    return %c0_i32, %c0_i32_0 : i32, i32
  }
  func.func @transform_5(%arg0: i32) -> (i32, i32, i32) {
    %c0_i32 = arith.constant 0 : i32
    %c0_i32_0 = arith.constant 0 : i32
    %c0_i32_1 = arith.constant 0 : i32
    %c0_i32_2 = arith.constant 0 : i32
    return %c0_i32, %c0_i32_0, %c0_i32_1 : i32, i32, i32
  }
  func.func @transform_6(%arg0: i32) -> (i32, i32) {
    %c0_i32 = arith.constant 0 : i32
    %c0_i32_0 = arith.constant 0 : i32
    %c0_i32_1 = arith.constant 0 : i32
    return %c0_i32, %c0_i32_0 : i32, i32
  }
  func.func @transform_7(%arg0: i32) -> (i32, i32) {
    %c0_i32 = arith.constant 0 : i32
    %c0_i32_0 = arith.constant 0 : i32
    %c0_i32_1 = arith.constant 0 : i32
    return %c0_i32, %c0_i32_0 : i32, i32
  }
  func.func @transform_8(%arg0: i32) -> (i32, i32) {
    %c0_i32 = arith.constant 0 : i32
    %c0_i32_0 = arith.constant 0 : i32
    %c0_i32_1 = arith.constant 0 : i32
    return %c0_i32, %c0_i32_0 : i32, i32
  }
  func.func @transform_9(%arg0: i32) -> (i32, i32) {
    %c0_i32 = arith.constant 0 : i32
    %c0_i32_0 = arith.constant 0 : i32
    %c0_i32_1 = arith.constant 0 : i32
    return %c0_i32, %c0_i32_0 : i32, i32
  }
  func.func @transform_10(%arg0: i32) -> (i32, i32) {
    %c0_i32 = arith.constant 0 : i32
    %c0_i32_0 = arith.constant 0 : i32
    %c0_i32_1 = arith.constant 0 : i32
    return %c0_i32, %c0_i32_0 : i32, i32
  }
  func.func @transform_11(%arg0: i32) -> (i32, i32) {
    %c0_i32 = arith.constant 0 : i32
    %c0_i32_0 = arith.constant 0 : i32
    %c0_i32_1 = arith.constant 0 : i32
    return %c0_i32, %c0_i32_0 : i32, i32
  }
  func.func @transform_12(%arg0: i32) -> (i32, i32) {
    %c0_i32 = arith.constant 0 : i32
    %c0_i32_0 = arith.constant 0 : i32
    %c0_i32_1 = arith.constant 0 : i32
    return %c0_i32, %c0_i32_0 : i32, i32
  }
  func.func @transform_13(%arg0: i32) -> (i32, i32, i32) {
    %c0_i32 = arith.constant 0 : i32
    %c0_i32_0 = arith.constant 0 : i32
    %c0_i32_1 = arith.constant 0 : i32
    %c0_i32_2 = arith.constant 0 : i32
    return %c0_i32, %c0_i32_0, %c0_i32_1 : i32, i32, i32
  }
  func.func @transform_14(%arg0: i32) -> (i32, i32) {
    %c0_i32 = arith.constant 0 : i32
    %c0_i32_0 = arith.constant 0 : i32
    %c0_i32_1 = arith.constant 0 : i32
    return %c0_i32, %c0_i32_0 : i32, i32
  }
  func.func @transform_15(%arg0: i32) -> (i32, i32) {
    %c0_i32 = arith.constant 0 : i32
    %c0_i32_0 = arith.constant 0 : i32
    %c0_i32_1 = arith.constant 0 : i32
    return %c0_i32, %c0_i32_0 : i32, i32
  }
  func.func @transform_16(%arg0: i32) -> (i32, i32) {
    %c0_i32 = arith.constant 0 : i32
    %c0_i32_0 = arith.constant 0 : i32
    %c0_i32_1 = arith.constant 0 : i32
    return %c0_i32, %c0_i32_0 : i32, i32
  }
  func.func @transform_17(%arg0: i32) -> (i32, i32) {
    %c0_i32 = arith.constant 0 : i32
    %c0_i32_0 = arith.constant 0 : i32
    %c0_i32_1 = arith.constant 0 : i32
    return %c0_i32, %c0_i32_0 : i32, i32
  }
  func.func @transform_18(%arg0: i32) -> (i32, i32) {
    %c0_i32 = arith.constant 0 : i32
    %c0_i32_0 = arith.constant 0 : i32
    %c0_i32_1 = arith.constant 0 : i32
    return %c0_i32, %c0_i32_0 : i32, i32
  }
  func.func @transform_19(%arg0: i32) -> (i32, i32) {
    %c0_i32 = arith.constant 0 : i32
    %c0_i32_0 = arith.constant 0 : i32
    %c0_i32_1 = arith.constant 0 : i32
    return %c0_i32, %c0_i32_0 : i32, i32
  }
  func.func @transform_20(%arg0: i32) -> (i32, i32) {
    %c0_i32 = arith.constant 0 : i32
    %c0_i32_0 = arith.constant 0 : i32
    %c0_i32_1 = arith.constant 0 : i32
    return %c0_i32, %c0_i32_0 : i32, i32
  }
  func.func @transform_21(%arg0: i32) -> (i32, i32) {
    %c0_i32 = arith.constant 0 : i32
    %c0_i32_0 = arith.constant 0 : i32
    %c0_i32_1 = arith.constant 0 : i32
    return %c0_i32, %c0_i32_0 : i32, i32
  }
  func.func @transform_22(%arg0: i32) -> (i32, i32) {
    %c0_i32 = arith.constant 0 : i32
    %c0_i32_0 = arith.constant 0 : i32
    %c0_i32_1 = arith.constant 0 : i32
    return %c0_i32, %c0_i32_0 : i32, i32
  }
  func.func @transform_23(%arg0: i32) -> (i32, i32, i32) {
    %c0_i32 = arith.constant 0 : i32
    %c0_i32_0 = arith.constant 0 : i32
    %c0_i32_1 = arith.constant 0 : i32
    return %arg0, %c0_i32, %c0_i32_0 : i32, i32, i32
  }
}

</mosaic_0001>

<bundles_post_ra>
// kernel: decoder_block.1
= control target key start
LH: loop header
LB: loop body
LE: loop exit
PB: predicated region body
PF: predicated region fallthrough
CT: control target
= control target key end

     0   :  { %s2575_s0 = inlined_call_operand.vmem [shape: f32[2,8,32], index: 0, kind: input, shape index: {}]   ;;  %s2576_s1 = inlined_call_operand.vmem [shape: f32[2,8,32], index: 1, kind: input, shape index: {}]   ;;  %s2577_s2 = inlined_call_operand.vmem [shape: f32[2,1,8], index: 2, kind: input, shape index: {}]   ;;  %s2578_s3 = inlined_call_operand.vmem [shape: bf16[32,96], index: 3, kind: input, shape index: {}]   ;;  %s2579_s4 = inlined_call_operand.vmem [shape: f32[1,96], index: 4, kind: input, shape index: {}]   ;;  %s2580_s5 = inlined_call_operand.vmem [shape: bf16[4,8,32], index: 5, kind: input, shape index: {}]   ;;  %s2581_s6 = inlined_call_operand.vmem [shape: f32[1,32], index: 6, kind: input, shape index: {}]   ;;  %s2582_s7 = inlined_call_operand.vmem [shape: f32[1,32], index: 7, kind: input, shape index: {}]   ;;  %s2583_s8 = inlined_call_operand.vmem [shape: f32[1,32], index: 8, kind: input, shape index: {}]   ;;  %s2584_s9 = inlined_call_operand.vmem [shape: bf16[32,32], index: 9, kind: input, shape index: {}]   ;;  %s2585_s10 = inlined_call_operand.vmem [shape: f32[1,32], index: 10, kind: input, shape index: {}]   ;;  %s2586_s11 = inlined_call_operand.vmem [shape: bf16[32,64], index: 11, kind: input, shape index: {}]   ;;  %s2587_s12 = inlined_call_operand.vmem [shape: f32[1,64], index: 12, kind: input, shape index: {}]   ;;  %s2588_s13 = inlined_call_operand.vmem [shape: bf16[4,8,32], index: 13, kind: input, shape index: {}]   ;;  %s2589_s14 = inlined_call_operand.vmem [shape: f32[1,32], index: 14, kind: input, shape index: {}]   ;;  %s2590_s15 = inlined_call_operand.vmem [shape: f32[1,32], index: 15, kind: input, shape index: {}]   ;;  %s2591_s16 = inlined_call_operand.vmem [shape: f32[1,32], index: 16, kind: input, shape index: {}]   ;;  %s2592_s17 = inlined_call_operand.vmem [shape: bf16[32,64], index: 17, kind: input, shape index: {}]   ;;  %s2593_s18 = inlined_call_operand.vmem [shape: f32[1,64], index: 18, kind: input, shape index: {}]   ;;  %s2594_s19 = inlined_call_operand.vmem [shape: bf16[64,32], index: 19, kind: input, shape index: {}]   ;;  %s2595_s20 = inlined_call_operand.vmem [shape: f32[1,32], index: 20, kind: input, shape index: {}]   ;;  %s2596_s21 = inlined_call_operand.vmem [shape: f32[1,32], index: 21, kind: input, shape index: {}]   ;;  %s2597_s22 = inlined_call_operand.vmem [shape: f32[1,32], index: 22, kind: input, shape index: {}]   ;;  %s2598_s23 = inlined_call_operand.hbm [shape: f32[2,8,32], index: 23, kind: output, shape index: {}]  }
   0x1   :  { %2619 = sst [smem:[#allocation11_spill]] %s2575_s0 }
   0x2   :  { %2620 = sst [smem:[#allocation12_spill]] %s2576_s1 }
   0x3   :  { %2621 = sst [smem:[#allocation13_spill]] %s2577_s2 }
   0x4   :  { %2622 = sst [smem:[#allocation14_spill]] %s2578_s3 }
   0x5   :  { %2623 = sst [smem:[#allocation15_spill]] %s2579_s4 }
   0x6   :  { %2624 = sst [smem:[#allocation16_spill]] %s2580_s5 }
   0x7   :  { %2625 = sst [smem:[#allocation17_spill]] %s2581_s6 }
   0x8   :  { %2626 = sst [smem:[#allocation18_spill]] %s2582_s7 }
   0x9   :  { %2627 = sst [smem:[#allocation19_spill]] %s2583_s8 }
   0xa   :  { %28 = vsyncpa [#allocation3], 0 }
   0xb   :  { %30 = vsyncpa [#allocation3 + $0x1], 0  ;;  %s2226_s4 = smov 0   ;;  %s2228_s30 = smov 0  }
   0xc   :  { %s2230_s24 = smov 0   ;;  %s2232_s25 = smov 0  }
   0xd LB: > { %2628 = sst [smem:[#allocation5_spill]] %s2079_s4  ;;  %s2247_s5 = sadd.s32 4294967295, %s2091_s25   ;;  %s2091_s25 = sphi %s2232_s25, %s2655_s25   ;;  %s2087_s24 = sphi %s2230_s24, %s2657_s24   ;;  %s2083_s30 = sphi %s2228_s30, %s2659_s30   ;;  %s2079_s4 = sphi %s2226_s4, %s2658_s4  }
   0xe   : > { %2629 = sst [smem:[#allocation6_spill]] %s2087_s24  ;;  %s1818_s1 = sadd.s32 4294967294, %s2091_s25  }
   0xf   : > { %2630 = sst [smem:[#allocation7_spill]] %s2091_s25  ;;  %s2251_s26 = sadd.s32 1, %s2091_s25  }
  0x10   : > { %2631 = sst [smem:[#allocation8_spill]] %s2251_s26  ;;  %s541_s2 = sadd.s32 1, %s2087_s24 }
  0x11   : > { %s538_s6 = ssub.s32 %s2091_s25, %s2251_s26  ;;  %p551_p0 = scmp.ne.s32.totalorder %s2087_s24, %s2083_s30 }
  0x12   : > { %p539_p1 = scmp.eq.s32.totalorder %s538_s6, 0  ;;  %p552_p2 = scmp.eq.s32.totalorder %s2247_s5, 1 }
  0x13   : > { %p557_p3 = scmp.ne.s32.totalorder %s2083_s30, %s2079_s4  ;;  %p558_p4 = scmp.eq.s32.totalorder %s1818_s1, 1 }
  0x14   : > { %s2262_s27 = scalar_select %p539_p1, %s2087_s24, %s541_s2  }
  0x15   : > { %p2264_p5 = por %p552_p2, %p551_p0  ;;  %p2268_p6 = por %p558_p4, %p557_p3 }
  0x16   : > { %2632 = sst [smem:[#allocation9_spill]] %s2262_s27  ;;  %p1821_p7 = scmp.ge.s32.totalorder %s2091_s25, 1 }
  0x17   : > { %s2634_s28 = scalar_select %p2268_p6, 1, 0 }
  0x18   : > { %p656_p8 = scmp.lt.s32.totalorder %s2091_s25, 3 }
  0x19   : > { %2635 = sst [smem:[#allocation10_spill]] %s2634_s28 }
  0x1a   : > { %p657_p9 = pnand %p1821_p7, %p656_p8 }
  0x1b   : > { %s2636_s0 = sld [smem:[#allocation14_spill]] (!%p657_p9)  ;;  %p726_p10 = scmp.lt.s32.totalorder (!%p657_p9), %s2247_s5, 1 }
  0x1c   : > { %660 = sbr.rel (%p657_p9) target bundleno = 3919 (0xf4f), region = 112  ;;  %s2637_s28 = sld [smem:[#allocation11_spill]] (!%p657_p9) }
  0x1d   : > { %s2638_s1 = sld [smem:[#allocation15_spill]] (!%p657_p9)  ;;  %s2608_s24 = smov (!%p657_p9), 88  }
  0x1e   : > { %s2611_s26 = smov (!%p657_p9), 120   ;;  %s2606_s2 = smov (!%p657_p9), 72  }
  0x1f   : > { %s2609_s29 = smov (!%p657_p9), 112   ;;  %s2100_s3 = smov (!%p657_p9), 56  }
  0x20   : > { %s2643_s8 = sld [smem:[#allocation19_spill]] (!%p657_p9)  ;;  %s2646_s25 = smov (!%p657_p9), 120  }
  0x21   : > { %v1913_v0 = vld [vmem:[%s2636_s0 + $0x8] sm:$0xff]  ;;  %v1912_v1 = vld [vmem:[%s2636_s0] sm:$0xff]  ;;  %s2282_s6 = scalar_select %p726_p10, %s2247_s5, 1  ;;  %vm769_vm0 = vcmask 261120   ;;  %vm792_vm1 = vcmask 64512   ;;  %vm831_vm2 = vcmask 1043456   ;;  %v740_v23 = vlaneseq }
  0x22   : > { %779 = vmatpush.bf16.msra.mxu0 %v1913_v0  ;;  %v2099_v27 = vmov 0.0   ;;  %s2647_s0 = smov 112   ;;  %vm1671_vm11 = vcmask 523264  }
  0x23   : > { %s1823_s27 = sshll.u32 %s2282_s6, 3  ;;  %v1976_v4 = vld [vmem:[%s2638_s1] ss:$0 sm:$0xff]  ;;  %v741_v24 = vshrl.u32 %v740_v23, 7  ;;  %v743_v25 = vand.u32 127, %v740_v23  ;;  %s2101_s1 = smov 40  }
  0x24   : > { %s729_s4 = scalar_lea.vmem %s2637_s28, %s1823_s27  ;;  %s2607_s28 = smov 80  }
  0x25   : > { %v2290_v2 = vld [vmem:[%s729_s4] sm:$0xff]  ;;  %s2615_s4 = smov 96   ;;  %vm744_vm3 = vcmp.gt.s32.totalorder %v743_v25, %v741_v24 }
  0x26   : > { %780 = vmatpush.bf16.msra.mxu0 %v1912_v1  ;;  %v748_v3 = vpack.c.bf16 %v2290_v2, %v2290_v2  ;;  %v2323_v28 = vsel %vm744_vm3, -1e+09, %v2099_v27 }
  0x29   : > { %1833 = vmatmul.msk.bf16.vlgmr.msra.gmra.mxu0 %vm769_vm0, %v748_v3 }
  0xa6   : > { %v782_v5 = vpop.f32.mrf.mxu0 }
  0xa7   : > { %v783_v6 = vadd.f32 %v1976_v4, %v782_v5 }
  0xa9   : > { %v786_v7 = vpack.c.bf16 %v783_v6, %v783_v6 }
  0xab   : > { %v788_v8 = vunpack.c.l.b16 %v786_v7 }
  0xad   : > { %v2298_v9 = vpack.c.b16 %v788_v8, %v788_v8 }
  0xae   : > { %v784_v10 = vpop.f32.mrf.mxu0 }
  0xaf   : > { %852 = vrot.lane.b32.xlu2 %v2298_v9, %s2608_s24  ;;  %790 = vrot.lane.b32.xlu0 %v2298_v9, %s2615_s4  ;;  %s2613_s24 = smov 104   ;;  %s723_s4 = sand.u32 1, %s2083_s30  }
  0xb7   : > { %850 = vrot.lane.b32.xlu2 %v2298_v9, %s2611_s26  ;;  %s2648_s26 = sld [smem:[#allocation13_spill]] }
  0xbf   : > { %951 = vrot.lane.b32.xlu2 %v2298_v9, %s2607_s28  ;;  %s2102_s28 = smov 64  }
  0xc7   : > { %1032 = vrot.lane.b32.xlu2 %v2298_v9, %s2606_s2  ;;  %s2639_s2 = sld [smem:[#allocation16_spill]] }
  0xcd   : > { %v849_v16 = vld [vmem:[%s2639_s2] sm:$0xf]  ;;  %v1838_v5 = vld [vmem:[%s2639_s2 + $0x4] sm:$0xf] }
  0xce   : > { %v934_v19 = vsel %vm831_vm2, %v849_v16, 0  ;;  %v915_v6 = vsel %vm831_vm2, %v1838_v5, 0 }
  0xcf   : > { %949 = vrot.lane.b32.xlu2 %v2298_v9, %s2609_s29  ;;  %924 = vmatpush.bf16.msrb.mxu0 %v915_v6  ;;  %s2640_s29 = sld [smem:[#allocation17_spill]] }
 0x109   : > { %v853_v11 = vpop.permute.xlu2 %852 }
 0x10a   : > { %v858_v12 = vsel %vm792_vm1, %v853_v11, 0 }
 0x10b   : > { %867 = vmatpush.bf16.xpose.msra.mxu3 %v858_v12 }
 0x111   : > { %v851_v13 = vpop.permute.xlu2 %850 }
 0x112   : > { %1836 = vmatmul.msk.bf16.vlgmr.msra.gmra.mxu3 %vm792_vm1, %v851_v13 }
 0x119   : > { %v952_v14 = vpop.permute.xlu2 %951 }
 0x11a   : > { %v957_v15 = vsel %vm792_vm1, %v952_v14, 0 }
 0x11b   : > { %966 = vmatpush.bf16.xpose.msrb.mxu3 %v957_v15 }
 0x121   : > { %v1033_v17 = vpop.permute.xlu2 %1032  ;;  %v791_v18 = vpop.permute.xlu0 %790 }
 0x122   : > { %v797_v20 = vsel %vm792_vm1, %v791_v18, 0  ;;  %v1038_v22 = vsel %vm792_vm1, %v1033_v17, 0 }
 0x123   : > { %806 = vmatpush.bf16.xpose.msra.mxu1 %v797_v20 }
 0x129   : > { %v950_v21 = vpop.permute.xlu2 %949 }
 0x12a   : > { %1834 = vmatmul.msk.bf16.vlgmr.msra.gmra.mxu1 %vm792_vm1, %v786_v7  ;;  %1841 = vmatmul.msk.bf16.vlgmr.msrb.gmra.mxu3 %vm792_vm1, %v950_v21 }
 0x12b   : > { %943 = vmatpush.bf16.msrb.mxu1 %v934_v19 }
 0x12f   : > { %1047 = vmatpush.bf16.xpose.msra.mxu1 %v1038_v22 }
 0x195   : > { %v869_v26 = vpop.f32.mrf.mxu3 }
 0x196   : > { %v873_v29 = vmul.f32 0.35355338, %v869_v26 }
 0x198   : > { %v874_v30 = vadd.f32 %v873_v29, %v2323_v28 }
 0x19a   : > { %v875_v31 = vsel %vm792_vm1, %v874_v30, -inf }
 0x19b   : > { %876 = vmax.xlane.f32.xlu2 %v875_v31 }
 0x19d   : > { %v871_v32 = vpop.f32.mrf.mxu3 }
 0x1a7   : > { %v808_v33 = vpop.f32.mrf.mxu1 }
 0x1a8   : > { %v812_v34 = vmul.f32 0.35355338, %v808_v33 }
 0x1aa   : > { %v813_v35 = vadd.f32 %v812_v34, %v2323_v28 }
 0x1ac   : > { %v814_v36 = vsel %vm792_vm1, %v813_v35, -inf }
 0x1ad   : > { %v968_v37 = vpop.f32.mrf.mxu3  ;;  %815 = vmax.xlane.f32.xlu0 %v814_v36 }
 0x1ae   : > { %v972_v38 = vmul.f32 0.35355338, %v968_v37 }
 0x1af   : > { %v810_v39 = vpop.f32.mrf.mxu1 }
 0x1b0   : > { %v2330_v40 = vadd.f32 %v972_v38, %v2323_v28 }
 0x1b2   : > { %v974_v41 = vsel %vm792_vm1, %v2330_v40, -inf }
 0x1b5   : > { %v970_v42 = vpop.f32.mrf.mxu3  ;;  %975 = vmax.xlane.f32.xlu0 %v974_v41 }
 0x20e   : > { %v877_v43 = vpop.xlane.xlu2 %876 }
 0x20f   : > { %v878_v44 = vsub.f32 %v874_v30, %v877_v43 }
 0x211   : > { %v879_v45 = vmul.f32 1.442695, %v878_v44 }
 0x213   : > { %1989 = vpow2.f32 %v879_v45  ;;  %v1843_v45 = vld [vmem:[%s2639_s2 + $0x8] sm:$0xf] }
 0x219   : > { %v1990_v46 = vpop.eup %1989 }
 0x21a   : > { %v881_v47 = vsel %vm792_vm1, %v1990_v46, 0.0 }
 0x21b   : > { %882 = vadd.xlane.f32.xlu0 %v881_v47 }
 0x220   : > { %v816_v48 = vpop.xlane.xlu0 %815 }
 0x221   : > { %v817_v49 = vsub.f32 %v813_v35, %v816_v48 }
 0x223   : > { %v818_v50 = vmul.f32 1.442695, %v817_v49 }
 0x225   : > { %1991 = vpow2.f32 %v818_v50 }
 0x228   : > { %v976_v53 = vpop.xlane.xlu0 %975 }
 0x229   : > { %v977_v17 = vsub.f32 %v2330_v40, %v976_v53 }
 0x22b   : > { %v1992_v51 = vpop.eup %1991  ;;  %v978_v18 = vmul.f32 1.442695, %v977_v17  ;;  %v1914_v17 = vld [vmem:[%s2584_s9] sm:$0xff] }
 0x22c   : > { %v820_v52 = vsel %vm792_vm1, %v1992_v51, 0.0 }
 0x22d   : > { %821 = vadd.xlane.f32.xlu1 %v820_v52 }
 0x22f   : > { %887 = vrot.lane.b32.xlu0 %v2298_v9, %s2100_s3  ;;  %s2641_s3 = sld [smem:[#allocation12_spill]] }
 0x237   : > { %1067 = vrot.lane.b32.xlu0 %v2298_v9, %s2101_s1  ;;  %s2104_s1 = smov 48  }
 0x246   : > { %826 = vrot.lane.b32.xlu1 %v2298_v9, %s2102_s28 }
 0x24e   : > { %1030 = vrot.lane.b32.xlu1 %v2298_v9, %s2613_s24  ;;  %s2642_s24 = sld [smem:[#allocation18_spill]] }
 0x28e   : > { %v883_v54 = vpop.xlane.xlu0 %882 }
 0x2a0   : > { %v822_v58 = vpop.xlane.xlu1 %821 }
 0x2a1   : > { %v888_v55 = vpop.permute.xlu0 %887  ;;  %1993 = vrcp.f32 %v822_v58 }
 0x2a2   : > { %v893_v63 = vsel %vm831_vm2, %v888_v55, 0  ;;  %1995 = vrcp.f32 %v883_v54  ;;  %v1977_v55 = vld [vmem:[%s2640_s29] ss:$0 sm:$0xff]  ;;  %s733_s29 = scalar_lea.vmem %s2641_s3, %s1823_s27  ;;  %s2644_s3 = smov 96  }
 0x2a3   : > { %1997 = vpow2.f32 %v978_v18  ;;  %s2651_s27 = smov 72  }
 0x2a7   : > { %v1994_v59 = vpop.eup %1993 }
 0x2a8   : > { %v824_v60 = vmul.f32 %v1994_v59, %v1992_v51  ;;  %v1996_v1 = vpop.eup %1995 }
 0x2a9   : > { %v1068_v56 = vpop.permute.xlu0 %1067  ;;  %v885_v3 = vmul.f32 %v1996_v1, %v1990_v46  ;;  %v1998_v27 = vpop.eup %1997  ;;  %v1014_v46 = vsel %vm831_vm2, %v1843_v45, 0 }
 0x2aa   : > { %v1073_v57 = vsel %vm831_vm2, %v1068_v56, 0  ;;  %v825_v0 = vpack.c.bf16 %v824_v60, %v824_v60  ;;  %v980_v29 = vsel %vm792_vm1, %v1998_v27, 0.0  ;;  %1023 = vmatpush.bf16.msra.mxu0 %v1014_v46 }
 0x2ab   : > { %1082 = vmatpush.bf16.msra.mxu3 %v1073_v57  ;;  %v886_v4 = vpack.c.bf16 %v885_v3, %v885_v3 }
 0x2b8   : > { %v827_v61 = vpop.permute.xlu1 %826 }
 0x2b9   : > { %v833_v62 = vsel %vm831_vm2, %v827_v61, 0 }
 0x2ba   : > { %842 = vmatpush.bf16.msra.mxu2 %v833_v62 }
 0x2bd   : > { %1835 = vmatmul.msk.bf16.vlgmr.msra.gmra.mxu2 %vm792_vm1, %v825_v0 }
 0x2be   : > { %902 = vmatpush.bf16.msrb.mxu2 %v893_v63  ;;  %v2105_v63 = vmov 32.0  }
 0x2c0   : > { %v1031_v13 = vpop.permute.xlu1 %1030 }
 0x2cd   : > { %1837 = vmatmul.msk.bf16.vlgmr.msrb.gmra.mxu2 %vm792_vm1, %v886_v4 }
 0x340   : > { %v844_v7 = vpop.f32.mrf.mxu2 }
 0x341   : > { %v848_v8 = vpack.c.bf16 %v844_v7, %v844_v7 }
 0x343   : > { %1840 = vmatmul.msk.bf16.vlgmr.msrb.gmra.mxu1 %vm792_vm1, %v848_v8 }
 0x348   : > { %v846_v10 = vpop.f32.mrf.mxu2 }
 0x350   : > { %v904_v11 = vpop.f32.mrf.mxu2 }
 0x351   : > { %v908_v12 = vpack.c.bf16 %v904_v11, %v904_v11 }
 0x353   : > { %1839 = vmatmul.msk.bf16.vlgmr.msrb.gmra.mxu0 %vm792_vm1, %v908_v12  ;;  %1845 = vmatmul.msk.bf16.vlgmr.msra.gmra.mxu1 %vm792_vm1, %v1031_v13  ;;  %v1917_v12 = vld [vmem:[%s2586_s11 + $0x8] sm:$0xff]  ;;  %v739_v13 = vld [vmem:[%s733_s29] sm:$0xff]  ;;  %s2645_s29 = smov 104  }
 0x354   : > { %1224 = vmatpush.bf16.msrb.mxu1 %v1917_v12 }
 0x358   : > { %v906_v14 = vpop.f32.mrf.mxu2 }
 0x359   : > { %v1916_v14 = vld [vmem:[%s2586_s11] sm:$0xff] }
 0x35a   : > { %1225 = vmatpush.bf16.msrb.mxu1 %v1916_v14 }
 0x3c0   : > { %v945_v15 = vpop.f32.mrf.mxu1 }
 0x3c8   : > { %v947_v16 = vpop.f32.mrf.mxu1 }
 0x3c9   : > { %v1915_v16 = vld [vmem:[%s2584_s9 + $0x8] sm:$0xff] }
 0x3ca   : > { %1186 = vmatpush.bf16.msrb.mxu0 %v1915_v16 }
 0x3ce   : > { %1187 = vmatpush.bf16.msrb.mxu0 %v1914_v17 }
 0x3d0   : > { %v926_v19 = vpop.f32.mrf.mxu0  ;;  %v1049_v20 = vpop.f32.mrf.mxu1 }
 0x3d1   : > { %v946_v21 = vadd.f32 %v945_v15, %v926_v19  ;;  %v1053_v22 = vmul.f32 0.35355338, %v1049_v20  ;;  %v1194_v15 = vpack.c.bf16 %v739_v13, %v739_v13 }
 0x3d3   : > { %v1054_v23 = vadd.f32 %v1053_v22, %v2323_v28  ;;  %1866 = vmatmul.msk.bf16.vlgmr.msrb.gmra.mxu1 %vm769_vm0, %v1194_v15 }
 0x3d5   : > { %v1055_v24 = vsel %vm792_vm1, %v1054_v23, -inf }
 0x3d6   : > { %1056 = vmax.xlane.f32.xlu1 %v1055_v24 }
 0x3d8   : > { %v928_v25 = vpop.f32.mrf.mxu0  ;;  %v1051_v26 = vpop.f32.mrf.mxu1 }
 0x3de   : > { %981 = vadd.xlane.f32.xlu1 %v980_v29 }
 0x449   : > { %v1057_v30 = vpop.xlane.xlu1 %1056 }
 0x44a   : > { %v1058_v31 = vsub.f32 %v1054_v23, %v1057_v30  ;;  %v1979_v30 = vld [vmem:[%s2643_s8] ss:$0 sm:$0xff] }
 0x44c   : > { %v1059_v32 = vmul.f32 1.442695, %v1058_v31 }
 0x44e   : > { %1999 = vpow2.f32 %v1059_v32 }
 0x451   : > { %v982_v28 = vpop.xlane.xlu1 %981 }
 0x452   : > { %2001 = vrcp.f32 %v982_v28  ;;  %v1980_v28 = vld [vmem:[%s2587_s12] ss:$0 sm:$0xff] }
 0x454   : > { %v2000_v33 = vpop.eup %1999 }
 0x455   : > { %v1061_v34 = vsel %vm792_vm1, %v2000_v33, 0.0 }
 0x456   : > { %1062 = vadd.xlane.f32.xlu2 %v1061_v34 }
 0x458   : > { %v2002_v36 = vpop.eup %2001 }
 0x459   : > { %v984_v38 = vmul.f32 %v2002_v36, %v1998_v27  ;;  %v1978_v27 = vld [vmem:[%s2642_s24] ss:$0 sm:$0xff] }
 0x45b   : > { %v985_v43 = vpack.c.bf16 %v984_v38, %v984_v38 }
 0x46e   : > { %986 = vrot.lane.b32.xlu2 %v2298_v9, %s2104_s1  ;;  %v1847_v9 = vld [vmem:[%s2639_s2 + $0xc] sm:$0xf]  ;;  %s736_s2 = scalar_lea.vmem %s2648_s26, %s2282_s6  ;;  %s1822_s26 = sshll.u32 %s723_s4, 3 }
 0x46f   : > { %v1095_v44 = vsel %vm831_vm2, %v1847_v9, 0  ;;  %s1723_s6 = scalar_lea.sflag [#allocation3], %s723_s4 }
 0x4c9   : > { %v1063_v35 = vpop.xlane.xlu2 %1062 }
 0x4ca   : > { %2003 = vrcp.f32 %v1063_v35  ;;  %v1227_v35 = vpop.f32.mrf.mxu1 }
 0x4cb   : > { %2005 = vrcp.f32 %v2105_v63  ;;  %v1228_v36 = vadd.f32 %v1980_v28, %v1227_v35  ;;  %v1293_v63 = vld [vmem:[%s2588_s13] sm:$0xf] }
 0x4d0   : > { %v2004_v37 = vpop.eup %2003 }
 0x4d1   : > { %v1065_v39 = vmul.f32 %v2004_v37, %v2000_v33  ;;  %v987_v40 = vpop.permute.xlu2 %986  ;;  %v2006_v0 = vpop.eup %2005  ;;  %v1231_v37 = vpack.c.bf16 %v1228_v36, %v1228_v36 }
 0x4d2   : > { %v992_v41 = vsel %vm831_vm2, %v987_v40, 0  ;;  %v1123_v1 = vmul.f32 32.0, %v2006_v0  ;;  %vm1127_vm4 = vweird.f32 %v2006_v0 }
 0x4d3   : > { %v1066_v42 = vpack.c.bf16 %v1065_v39, %v1065_v39  ;;  %1001 = vmatpush.bf16.msra.mxu2 %v992_v41  ;;  %v1236_v38 = vsel %vm792_vm1, %v1231_v37, 0  ;;  %v1269_v39 = vunpack.c.l.b16 %v1231_v37  ;;  %v1229_v41 = vpop.f32.mrf.mxu1 }
 0x4d4   : > { %v1124_v3 = vsub.f32 1.0, %v1123_v1  ;;  %1245 = vmatpush.bf16.xpose.msrb.mxu3 %v1236_v38 }
 0x4d5   : > { %1846 = vmatmul.msk.bf16.vlgmr.msra.gmra.mxu3 %vm792_vm1, %v1066_v42  ;;  %v2415_v40 = vpack.c.b16 %v1269_v39, %v1269_v39  ;;  %v1981_v42 = vld [vmem:[%s2585_s10] ss:$0 sm:$0xff] }
 0x4d6   : > { %1842 = vmatmul.msk.bf16.vlgmr.msra.gmra.mxu2 %vm792_vm1, %v985_v43  ;;  %v1125_v4 = vmul.f32 %v2006_v0, %v1124_v3 }
 0x4d7   : > { %1104 = vmatpush.bf16.msrb.mxu2 %v1095_v44  ;;  %1271 = vrot.lane.b32.xlu2 %v2415_v40, %s2644_s3  ;;  %s2649_s3 = smov 88  }
 0x4d8   : > { %v1126_v5 = vadd.f32 %v2006_v0, %v1125_v4 }
 0x4da   : > { %v2377_v6 = vsel %vm1127_vm4, %v2006_v0, %v1126_v5  ;;  %v1381_v0 = vsel %vm831_vm2, %v1293_v63, 0 }
 0x558   : > { %v1084_v47 = vpop.f32.mrf.mxu3 }
 0x559   : > { %v1088_v48 = vpack.c.bf16 %v1084_v47, %v1084_v47  ;;  %v1003_v49 = vpop.f32.mrf.mxu2 }
 0x55a   : > { %v1007_v50 = vpack.c.bf16 %v1003_v49, %v1003_v49 }
 0x55b   : > { %1848 = vmatmul.msk.bf16.vlgmr.msrb.gmra.mxu2 %vm792_vm1, %v1088_v48  ;;  %v1272_v48 = vpop.permute.xlu2 %1271 }
 0x55c   : > { %1844 = vmatmul.msk.bf16.vlgmr.msra.gmra.mxu0 %vm792_vm1, %v1007_v50  ;;  %v1277_v49 = vsel %vm831_vm2, %v1272_v48, 0  ;;  %v746_v50 = vld [vmem:[%s736_s2] sm:$0x1]  ;;  %s1909_s2 = sshll.u32 %s2247_s5, 3 }
 0x55d   : > { %1286 = vmatpush.bf16.msra.mxu2 %v1277_v49 }
 0x560   : > { %v1086_v51 = vpop.f32.mrf.mxu3 }
 0x561   : > { %v1005_v52 = vpop.f32.mrf.mxu2  ;;  %v747_v51 = vmul.f32 -1e+09, %v746_v50  ;;  %1390 = vmatpush.bf16.msrb.mxu2 %v1381_v0  ;;  %v1871_v0 = vld [vmem:[%s2588_s13 + $0x4] sm:$0xf] }
 0x563   : > { %v2434_v52 = vperm.slane %v747_v51, 0 }
 0x5d9   : > { %v1025_v53 = vpop.f32.mrf.mxu0 }
 0x5da   : > { %v1029_v54 = vadd.f32 %v1025_v53, %v946_v21 }
 0x5de   : > { %v1106_v56 = vpop.f32.mrf.mxu2 }
 0x5df   : > { %v1110_v57 = vadd.f32 %v1106_v56, %v1029_v54 }
 0x5e1   : > { %v1115_v58 = vadd.f32 %v1977_v55, %v1110_v57  ;;  %v1027_v59 = vpop.f32.mrf.mxu0 }
 0x5e3   : > { %v1118_v60 = vadd.f32 %v1115_v58, %v2290_v2 }
 0x5e5   : > { %v1119_v61 = vsel %vm769_vm0, %v1118_v60, 0.0 }
 0x5e6   : > { %v1108_v62 = vpop.f32.mrf.mxu2  ;;  %1120 = vadd.xlane.f32.xlu1 %v1119_v61 }
 0x659   : > { %v1121_v7 = vpop.xlane.xlu1 %1120 }
 0x65a   : > { %v1129_v8 = vmul.f32 %v2377_v6, %v1121_v7 }
 0x65c   : > { %v1130_v10 = vsub.f32 %v1118_v60, %v1129_v8 }
 0x65e   : > { %v1131_v2 = vmul.f32 %v1130_v10, %v1130_v10 }
 0x660   : > { %v1132_v11 = vsel %vm769_vm0, %v1131_v2, 0.0 }
 0x661   : > { %1133 = vadd.xlane.f32.xlu0 %v1132_v11 }
 0x675   : > { %1479 = vrot.lane.b32.xlu0 %v2415_v40, %s2645_s29 }
 0x6d4   : > { %v1134_v18 = vpop.xlane.xlu0 %1133 }
 0x6d5   : > { %v1135_v19 = vmul.f32 %v1134_v18, %v2377_v6 }
 0x6d7   : > { %v1136_v20 = vadd.f32 1e-05, %v1135_v19 }
 0x6d9   : > { %2007 = vrsqrt.f32 %v1136_v20  ;;  %vm1143_vm6 = vweird.f32 %v1136_v20 }
 0x6df   : > { %v2008_v21 = vpop.eup %2007 }
 0x6e0   : > { %v1138_v22 = vmul.f32 %v2008_v21, %v1136_v20  ;;  %vm1144_vm5 = vweird.f32 %v2008_v21 }
 0x6e1   : > { %vm1145_vm7 = vmor %vm1143_vm6, %vm1144_vm5 }
 0x6e2   : > { %v1139_v23 = vmul.f32 %v2008_v21, %v1138_v22 }
 0x6e4   : > { %v1140_v24 = vmul.f32 0.5, %v1139_v23 }
 0x6e6   : > { %v1141_v25 = vsub.f32 1.5, %v1140_v24 }
 0x6e7   : > { %v1480_v5 = vpop.permute.xlu0 %1479 }
 0x6e8   : > { %v1142_v26 = vmul.f32 %v2008_v21, %v1141_v25  ;;  %v1485_v8 = vsel %vm792_vm1, %v1480_v5, 0 }
 0x6ea   : > { %v1146_v29 = vsel %vm1145_vm7, %v2008_v21, %v1142_v26 }
 0x6eb   : > { %v1147_v31 = vmul.f32 %v1146_v29, %v1130_v10 }
 0x6ed   : > { %v1151_v32 = vmul.f32 %v1978_v27, %v1147_v31 }
 0x6ef   : > { %v2406_v33 = vadd.f32 %v1979_v30, %v1151_v32 }
 0x6f1   : > { %v1156_v34 = vpack.c.bf16 %v2406_v33, %v2406_v33 }
 0x6f3   : > { %1857 = vmatmul.msk.bf16.vlgmr.msrb.gmra.mxu0 %vm769_vm0, %v1156_v34 }
 0x770   : > { %v1189_v43 = vpop.f32.mrf.mxu0 }
 0x771   : > { %v1190_v9 = vadd.f32 %v1981_v42, %v1189_v43 }
 0x773   : > { %v1193_v44 = vpack.c.bf16 %v1190_v9, %v1190_v9 }
 0x775   : > { %v1295_v45 = vunpack.c.l.b16 %v1193_v44  ;;  %1867 = vmatmul.msk.bf16.vlgmr.msrb.gmra.mxu3 %vm792_vm1, %v1193_v44 }
 0x777   : > { %v1296_v46 = vpack.c.b16 %v1295_v45, %v1295_v45 }
 0x778   : > { %v1191_v47 = vpop.f32.mrf.mxu0 }
 0x779   : > { %1297 = vrot.lane.b32.xlu2 %v1296_v46, %s2646_s25 }
 0x781   : > { %1398 = vrot.lane.b32.xlu2 %v2415_v40, %s2647_s0 }
 0x789   : > { %1396 = vrot.lane.b32.xlu2 %v1296_v46, %s2647_s0  ;;  %s725_s0 = scalar_lea.vmem [#allocation2], %s1822_s26  ;;  %s2049_s26 = scalar_lea.hbm %s2598_s23, 16 }
 0x78a   : > { %s1735_s5 = sshll.u32 %s725_s0, 4  ;;  %s1736_s5 = int_to_ptr.vmem [resolvable:$true] %s1735_s5 }
 0x7d3   : > { %v1298_v10 = vpop.permute.xlu2 %1297 }
 0x7db   : > { %v1399_v2 = vpop.permute.xlu2 %1398 }
 0x7dc   : > { %v1404_v13 = vsel %vm792_vm1, %v1399_v2, 0 }
 0x7e3   : > { %v1397_v14 = vpop.permute.xlu2 %1396 }
 0x7f8   : > { %v1247_v53 = vpop.f32.mrf.mxu3 }
 0x7f9   : > { %v1251_v54 = vmul.f32 0.35355338, %v1247_v53 }
 0x7fb   : > { %v1255_v55 = vadd.f32 %v2434_v52, %v1251_v54 }
 0x7fd   : > { %v1256_v56 = vsel %vm792_vm1, %v1255_v55, -inf }
 0x7fe   : > { %1257 = vmax.xlane.f32.xlu1 %v1256_v56 }
 0x800   : > { %v1249_v57 = vpop.f32.mrf.mxu3 }
 0x871   : > { %v1258_v58 = vpop.xlane.xlu1 %1257 }
 0x872   : > { %v1259_v59 = vsub.f32 %v1255_v55, %v1258_v58 }
 0x874   : > { %v1260_v60 = vmul.f32 1.442695, %v1259_v59 }
 0x876   : > { %2009 = vpow2.f32 %v1260_v60 }
 0x87c   : > { %v2010_v61 = vpop.eup %2009 }
 0x87d   : > { %v1262_v62 = vsel %vm792_vm1, %v2010_v61, 0.0 }
 0x87e   : > { %1263 = vadd.xlane.f32.xlu1 %v1262_v62 }
 0x897   : > { %1299 = vrot.lane.b32.xlu1 %v2415_v40, %s2646_s25 }
 0x89f   : > { %1477 = vrot.lane.b32.xlu1 %v1296_v46, %s2645_s29  ;;  %s2650_s29 = smov 80  }
 0x8f1   : > { %v1264_v1 = vpop.xlane.xlu1 %1263 }
 0x8f2   : > { %2011 = vrcp.f32 %v1264_v1  ;;  %v1362_v1 = vsel %vm831_vm2, %v1871_v0, 0 }
 0x8f3   : > { %1371 = vmatpush.bf16.msra.mxu3 %v1362_v1 }
 0x8f8   : > { %v2012_v3 = vpop.eup %2011 }
 0x8f9   : > { %v1266_v4 = vmul.f32 %v2012_v3, %v2010_v61  ;;  %v1876_v3 = vld [vmem:[%s2588_s13 + $0x8] sm:$0xf] }
 0x8fb   : > { %v1267_v7 = vpack.c.bf16 %v1266_v4, %v1266_v4  ;;  %v1461_v4 = vsel %vm831_vm2, %v1876_v3, 0 }
 0x8fc   : > { %1470 = vmatpush.bf16.msrb.mxu3 %v1461_v4 }
 0x8fd   : > { %1868 = vmatmul.msk.bf16.vlgmr.msra.gmra.mxu2 %vm792_vm1, %v1267_v7 }
 0x8fe   : > { %1494 = vmatpush.bf16.xpose.msra.mxu2 %v1485_v8 }
 0x909   : > { %v1300_v11 = vpop.permute.xlu1 %1299 }
 0x90a   : > { %v1305_v12 = vsel %vm792_vm1, %v1300_v11, 0 }
 0x90b   : > { %1314 = vmatpush.bf16.xpose.msra.mxu0 %v1305_v12 }
 0x911   : > { %v1478_v20 = vpop.permute.xlu1 %1477 }
 0x912   : > { %1869 = vmatmul.msk.bf16.vlgmr.msra.gmra.mxu0 %vm792_vm1, %v1298_v10 }
 0x913   : > { %1413 = vmatpush.bf16.xpose.msrb.mxu0 %v1404_v13 }
 0x922   : > { %1874 = vmatmul.msk.bf16.vlgmr.msrb.gmra.mxu0 %vm792_vm1, %v1397_v14 }
 0x980   : > { %v1288_v15 = vpop.f32.mrf.mxu2 }
 0x981   : > { %v1292_v16 = vpack.c.bf16 %v1288_v15, %v1288_v15 }
 0x983   : > { %1873 = vmatmul.msk.bf16.vlgmr.msrb.gmra.mxu2 %vm792_vm1, %v1292_v16 }
 0x988   : > { %v1290_v17 = vpop.f32.mrf.mxu2 }
 0x989   : > { %v1880_v17 = vld [vmem:[%s2588_s13 + $0xc] sm:$0xf] }
 0x98f   : > { %v1316_v18 = vpop.f32.mrf.mxu0 }
 0x990   : > { %v1320_v19 = vmul.f32 0.35355338, %v1316_v18  ;;  %v1542_v18 = vsel %vm831_vm2, %v1880_v17, 0 }
 0x992   : > { %v1321_v21 = vadd.f32 %v1320_v19, %v2434_v52 }
 0x993   : > { %1878 = vmatmul.msk.bf16.vlgmr.msra.gmra.mxu2 %vm792_vm1, %v1478_v20 }
 0x994   : > { %v1322_v22 = vsel %vm792_vm1, %v1321_v21, -inf }
 0x995   : > { %1323 = vmax.xlane.f32.xlu2 %v1322_v22 }
 0x997   : > { %v1318_v23 = vpop.f32.mrf.mxu0 }
 0x99f   : > { %v1415_v24 = vpop.f32.mrf.mxu0 }
 0x9a0   : > { %v1419_v25 = vmul.f32 0.35355338, %v1415_v24 }
 0x9a2   : > { %v1420_v26 = vadd.f32 %v1419_v25, %v2434_v52 }
 0x9a4   : > { %v1421_v27 = vsel %vm792_vm1, %v1420_v26, -inf }
 0x9a5   : > { %1422 = vmax.xlane.f32.xlu1 %v1421_v27 }
 0x9a7   : > { %v1417_v29 = vpop.f32.mrf.mxu0 }
 0x9a8   : > { %v1982_v29 = vld [vmem:[%s2589_s14] ss:$0 sm:$0xff] }
 0x9be   : > { %1334 = vrot.lane.b32.xlu1 %v2415_v40, %s2649_s3 }
 0xa06   : > { %v2460_v30 = vpop.f32.mrf.mxu2 }
 0xa08   : > { %v1324_v31 = vpop.xlane.xlu2 %1323 }
 0xa09   : > { %v1325_v32 = vsub.f32 %v1321_v21, %v1324_v31 }
 0xa0b   : > { %v1326_v34 = vmul.f32 1.442695, %v1325_v32 }
 0xa0d   : > { %2013 = vpow2.f32 %v1326_v34 }
 0xa0e   : > { %v1394_v28 = vpop.f32.mrf.mxu2 }
 0xa13   : > { %v2014_v35 = vpop.eup %2013 }
 0xa14   : > { %v1328_v36 = vsel %vm792_vm1, %v2014_v35, 0.0 }
 0xa15   : > { %1329 = vadd.xlane.f32.xlu2 %v1328_v36 }
 0xa16   : > { %v1496_v37 = vpop.f32.mrf.mxu2 }
 0xa17   : > { %v1500_v38 = vmul.f32 0.35355338, %v1496_v37 }
 0xa18   : > { %v1423_v39 = vpop.xlane.xlu1 %1422 }
 0xa19   : > { %v1424_v41 = vsub.f32 %v1420_v26, %v1423_v39  ;;  %v1501_v42 = vadd.f32 %v1500_v38, %v2434_v52 }
 0xa1b   : > { %v1425_v43 = vmul.f32 1.442695, %v1424_v41  ;;  %v1502_v9 = vsel %vm792_vm1, %v1501_v42, -inf }
 0xa1c   : > { %1503 = vmax.xlane.f32.xlu0 %v1502_v9 }
 0xa1d   : > { %2015 = vpow2.f32 %v1425_v43  ;;  %v1923_v43 = vld [vmem:[%s2594_s19 + $0x18] sm:$0xff] }
 0xa1e   : > { %v1498_v44 = vpop.f32.mrf.mxu2  ;;  %1679 = vmatpush.bf16.msrb.mxu2 %v1923_v43 }
 0xa23   : > { %v2016_v45 = vpop.eup %2015 }
 0xa24   : > { %v1427_v46 = vsel %vm792_vm1, %v2016_v45, 0.0 }
 0xa25   : > { %1428 = vadd.xlane.f32.xlu2 %v1427_v46 }
 0xa30   : > { %v1335_v47 = vpop.permute.xlu1 %1334  ;;  %1433 = vrot.lane.b32.xlu0 %v2415_v40, %s2650_s29 }
 0xa31   : > { %v1340_v48 = vsel %vm831_vm2, %v1335_v47, 0 }
 0xa32   : > { %1349 = vmatpush.bf16.msra.mxu1 %v1340_v48 }
 0xa88   : > { %v1330_v49 = vpop.xlane.xlu2 %1329 }
 0xa89   : > { %2017 = vrcp.f32 %v1330_v49 }
 0xa8f   : > { %v2018_v50 = vpop.eup %2017  ;;  %v1504_v51 = vpop.xlane.xlu0 %1503 }
 0xa90   : > { %v1332_v52 = vmul.f32 %v2018_v50, %v2014_v35  ;;  %v1505_v53 = vsub.f32 %v1501_v42, %v1504_v51  ;;  %v1919_v42 = vld [vmem:[%s2592_s17 + $0x8] sm:$0xff] }
 0xa92   : > { %v1333_v54 = vpack.c.bf16 %v1332_v52, %v1332_v52  ;;  %v1506_v55 = vmul.f32 1.442695, %v1505_v53  ;;  %v1983_v53 = vld [vmem:[%s2590_s15] ss:$0 sm:$0xff] }
 0xa94   : > { %2019 = vpow2.f32 %v1506_v55  ;;  %1870 = vmatmul.msk.bf16.vlgmr.msra.gmra.mxu1 %vm792_vm1, %v1333_v54  ;;  %v1984_v55 = vld [vmem:[%s2591_s16] ss:$0 sm:$0xff] }
 0xa98   : > { %v1429_v56 = vpop.xlane.xlu2 %1428 }
 0xa99   : > { %2021 = vrcp.f32 %v1429_v56 }
 0xa9a   : > { %v2020_v57 = vpop.eup %2019 }
 0xa9b   : > { %v1508_v58 = vsel %vm792_vm1, %v2020_v57, 0.0 }
 0xa9c   : > { %1509 = vadd.xlane.f32.xlu2 %v1508_v58 }
 0xa9f   : > { %v2022_v59 = vpop.eup %2021 }
 0xaa0   : > { %v1431_v60 = vmul.f32 %v2022_v59, %v2016_v45  ;;  %v1922_v45 = vld [vmem:[%s2594_s19 + $0x10] sm:$0xff] }
 0xaa1   : > { %1680 = vmatpush.bf16.msrb.mxu2 %v1922_v45 }
 0xaa2   : > { %v1434_v61 = vpop.permute.xlu0 %1433  ;;  %v1432_v63 = vpack.c.bf16 %v1431_v60, %v1431_v60  ;;  %v1921_v60 = vld [vmem:[%s2594_s19 + $0x8] sm:$0xff] }
 0xaa3   : > { %v1439_v62 = vsel %vm831_vm2, %v1434_v61, 0  ;;  %v1920_v61 = vld [vmem:[%s2594_s19] sm:$0xff] }
 0xaa4   : > { %1448 = vmatpush.bf16.msrb.mxu1 %v1439_v62  ;;  %v1985_v62 = vld [vmem:[%s2593_s18] ss:$0 sm:$0xff] }
 0xaa5   : > { %1681 = vmatpush.bf16.msrb.mxu2 %v1921_v60 }
 0xaa7   : > { %1875 = vmatmul.msk.bf16.vlgmr.msrb.gmra.mxu1 %vm792_vm1, %v1432_v63 }
 0xaa8   : > { %1551 = vmatpush.bf16.msra.mxu1 %v1542_v18 }
 0xaa9   : > { %1682 = vmatpush.bf16.msrb.mxu2 %v1920_v61 }
 0xab4   : > { %1514 = vrot.lane.b32.xlu2 %v2415_v40, %s2651_s27  ;;  %s1733_s27 = scalar_lea.hbm %s2598_s23, %s1909_s2 }
 0xab5   : > { %s1737_s24 = sshll.u32 %s1733_s27, 4  ;;  %s1738_s24 = int_to_ptr.hbm [resolvable:$true] %s1737_s24 }
 0xab6   : > { %s2043_s28 = sshra.s32 %s1738_s24, 4  ;;  %s2044_s28 = int_to_ptr.hbm [resolvable:$true] %s2043_s28 }
 0xab7   : > { %s2045_s2 = scalar_lea.hbm %s2044_s28, 8  ;;  %p2050_p0 = scmp.lt.s32.totalorder %s2044_s28, %s2598_s23 }
 0xab8   : > { %p2046_p11 = scmp.ne.s32.totalorder %s2044_s28, %s2045_s2  ;;  %p2051_p1 = scmp.lt.s32.totalorder %s2049_s26, %s2045_s2 }
 0xaba   : > { %p2047_p12 = pnand %p2046_p11, %p2264_p5  ;;  %p2052_p2 = por %p2051_p1, %p2050_p0 }
 0xabc   : > { %p2048_p13 = pneg %p2047_p12 }
 0xabe   : > { %p2053_p3 = pnand %p2052_p2, %p2048_p13 }
 0xb0f   : > { %v1510_v5 = vpop.xlane.xlu2 %1509 }
 0xb10   : > { %2023 = vrcp.f32 %v1510_v5  ;;  %v1986_v5 = vld [vmem:[%s2595_s20] ss:$0 sm:$0xff] }
 0xb11   : > { %v1351_v7 = vpop.f32.mrf.mxu1 }
 0xb12   : > { %v1355_v8 = vpack.c.bf16 %v1351_v7, %v1351_v7 }
 0xb14   : > { %1872 = vmatmul.msk.bf16.vlgmr.msra.gmra.mxu3 %vm792_vm1, %v1355_v8 }
 0xb15   : > { %1626 = vmatpush.bf16.msra.mxu3 %v1919_v42 }
 0xb16   : > { %v2024_v40 = vpop.eup %2023 }
 0xb17   : > { %v1512_v10 = vmul.f32 %v2024_v40, %v2020_v57  ;;  %v1515_v2 = vpop.permute.xlu2 %1514 }
 0xb18   : > { %v1520_v11 = vsel %vm831_vm2, %v1515_v2, 0 }
 0xb19   : > { %v1513_v12 = vpack.c.bf16 %v1512_v10, %v1512_v10  ;;  %v1353_v13 = vpop.f32.mrf.mxu1  ;;  %1529 = vmatpush.bf16.msra.mxu0 %v1520_v11 }
 0xb1c   : > { %1879 = vmatmul.msk.bf16.vlgmr.msra.gmra.mxu0 %vm792_vm1, %v1513_v12 }
 0xb24   : > { %v1450_v14 = vpop.f32.mrf.mxu1 }
 0xb25   : > { %v1454_v15 = vpack.c.bf16 %v1450_v14, %v1450_v14 }
 0xb27   : > { %1877 = vmatmul.msk.bf16.vlgmr.msrb.gmra.mxu3 %vm792_vm1, %v1454_v15 }
 0xb2c   : > { %v1452_v16 = vpop.f32.mrf.mxu1 }
 0xb97   : > { %v1373_v19 = vpop.f32.mrf.mxu3 }
 0xb98   : > { %v1393_v24 = vadd.f32 %v2460_v30, %v1373_v19 }
 0xb99   : > { %v1531_v20 = vpop.f32.mrf.mxu0 }
 0xb9a   : > { %v1535_v21 = vpack.c.bf16 %v1531_v20, %v1531_v20 }
 0xb9c   : > { %1881 = vmatmul.msk.bf16.vlgmr.msra.gmra.mxu1 %vm792_vm1, %v1535_v21 }
 0xb9f   : > { %v1375_v22 = vpop.f32.mrf.mxu3 }
 0xba1   : > { %v1533_v23 = vpop.f32.mrf.mxu0 }
 0xbaa   : > { %v1472_v25 = vpop.f32.mrf.mxu3 }
 0xbab   : > { %v1476_v26 = vadd.f32 %v1472_v25, %v1393_v24  ;;  %v1987_v25 = vld [vmem:[%s2596_s21] ss:$0 sm:$0xff] }
 0xbb2   : > { %v1474_v27 = vpop.f32.mrf.mxu3 }
 0xbb3   : > { %v1988_v27 = vld [vmem:[%s2597_s22] ss:$0 sm:$0xff] }
 0xc19   : > { %v1553_v31 = vpop.f32.mrf.mxu1 }
 0xc1a   : > { %v1557_v32 = vadd.f32 %v1553_v31, %v1476_v26 }
 0xc1c   : > { %v1562_v34 = vadd.f32 %v1982_v29, %v1557_v32 }
 0xc1e   : > { %v1565_v28 = vadd.f32 %v1562_v34, %v2406_v33  ;;  %v1918_v33 = vld [vmem:[%s2592_s17] sm:$0xff] }
 0xc1f   : > { %1627 = vmatpush.bf16.msra.mxu3 %v1918_v33 }
 0xc20   : > { %v1566_v35 = vsel %vm769_vm0, %v1565_v28, 0.0 }
 0xc21   : > { %1567 = vadd.xlane.f32.xlu1 %v1566_v35  ;;  %v1555_v36 = vpop.f32.mrf.mxu1 }
 0xc94   : > { %v1568_v37 = vpop.xlane.xlu1 %1567 }
 0xc95   : > { %v1569_v38 = vmul.f32 %v1568_v37, %v2377_v6 }
 0xc97   : > { %v1570_v30 = vsub.f32 %v1565_v28, %v1569_v38 }
 0xc99   : > { %v1571_v39 = vmul.f32 %v1570_v30, %v1570_v30 }
 0xc9b   : > { %v1572_v41 = vsel %vm769_vm0, %v1571_v39, 0.0 }
 0xc9c   : > { %1573 = vadd.xlane.f32.xlu0 %v1572_v41 }
 0xd0f   : > { %v1574_v9 = vpop.xlane.xlu0 %1573 }
 0xd10   : > { %v1575_v44 = vmul.f32 %v1574_v9, %v2377_v6 }
 0xd12   : > { %v1576_v46 = vadd.f32 1e-05, %v1575_v44 }
 0xd14   : > { %2025 = vrsqrt.f32 %v1576_v46  ;;  %vm1583_vm9 = vweird.f32 %v1576_v46 }
 0xd1a   : > { %v2026_v47 = vpop.eup %2025 }
 0xd1b   : > { %v1578_v48 = vmul.f32 %v2026_v47, %v1576_v46  ;;  %vm1584_vm8 = vweird.f32 %v2026_v47 }
 0xd1c   : > { %vm1585_vm10 = vmor %vm1583_vm9, %vm1584_vm8 }
 0xd1d   : > { %v1579_v49 = vmul.f32 %v2026_v47, %v1578_v48 }
 0xd1f   : > { %v1580_v50 = vmul.f32 0.5, %v1579_v49 }
 0xd21   : > { %v1581_v51 = vsub.f32 1.5, %v1580_v50 }
 0xd23   : > { %v1582_v52 = vmul.f32 %v2026_v47, %v1581_v51 }
 0xd25   : > { %v1586_v54 = vsel %vm1585_vm10, %v2026_v47, %v1582_v52 }
 0xd26   : > { %v1587_v56 = vmul.f32 %v1586_v54, %v1570_v30 }
 0xd28   : > { %v1591_v57 = vmul.f32 %v1983_v53, %v1587_v56 }
 0xd2a   : > { %v1595_v58 = vadd.f32 %v1984_v55, %v1591_v57 }
 0xd2c   : > { %v1596_v59 = vpack.c.bf16 %v1595_v58, %v1595_v58 }
 0xd2e   : > { %1890 = vmatmul.msk.bf16.vlgmr.msra.gmra.mxu3 %vm769_vm0, %v1596_v59 }
 0xdb1   : > { %v1629_v63 = vpop.f32.mrf.mxu3 }
 0xdb2   : > { %v1630_v0 = vadd.f32 %v1985_v62, %v1629_v63 }
 0xdb4   : > { %v1633_v1 = vmax.f32 %v1630_v0, 0.0 }
 0xdb6   : > { %v1634_v3 = vpack.c.bf16 %v1633_v1, %v1633_v1 }
 0xdb8   : > { %1907 = vmatmul.msk.bf16.vlgmr.msrb.gmra.mxu2 %vm1671_vm11, %v1634_v3 }
 0xdb9   : > { %v1631_v4 = vpop.f32.mrf.mxu3 }
 0xe3b   : > { %v1684_v7 = vpop.f32.mrf.mxu2 }
 0xe3c   : > { %v1685_v8 = vadd.f32 %v1986_v5, %v1684_v7 }
 0xe3e   : > { %v1690_v40 = vadd.f32 %v1685_v8, %v1595_v58 }
 0xe40   : > { %v1691_v10 = vsel %vm769_vm0, %v1690_v40, 0.0 }
 0xe41   : > { %1692 = vadd.xlane.f32.xlu2 %v1691_v10 }
 0xe43   : > { %v1686_v2 = vpop.f32.mrf.mxu2 }
 0xeb4   : > { %v1693_v11 = vpop.xlane.xlu2 %1692 }
 0xeb5   : > { %v1694_v12 = vmul.f32 %v1693_v11, %v2377_v6 }
 0xeb7   : > { %v1695_v13 = vsub.f32 %v1690_v40, %v1694_v12 }
 0xeb9   : > { %v1696_v14 = vmul.f32 %v1695_v13, %v1695_v13 }
 0xebb   : > { %v1697_v15 = vsel %vm769_vm0, %v1696_v14, 0.0 }
 0xebc   : > { %1698 = vadd.xlane.f32.xlu1 %v1697_v15 }
 0xf2f   : > { %v1699_v16 = vpop.xlane.xlu1 %1698 }
 0xf30   : > { %v1700_v17 = vmul.f32 %v1699_v16, %v2377_v6 }
 0xf32   : > { %v1701_v18 = vadd.f32 1e-05, %v1700_v17 }
 0xf34   : > { %2027 = vrsqrt.f32 %v1701_v18  ;;  %vm1708_vm13 = vweird.f32 %v1701_v18 }
 0xf3a   : > { %v2028_v19 = vpop.eup %2027 }
 0xf3b   : > { %v1703_v20 = vmul.f32 %v2028_v19, %v1701_v18  ;;  %vm1709_vm12 = vweird.f32 %v2028_v19 }
 0xf3c   : > { %vm1710_vm14 = vmor %vm1708_vm13, %vm1709_vm12 }
 0xf3d   : > { %v1704_v21 = vmul.f32 %v2028_v19, %v1703_v20 }
 0xf3f   : > { %v1705_v22 = vmul.f32 0.5, %v1704_v21 }
 0xf41   : > { %v1706_v23 = vsub.f32 1.5, %v1705_v22 }
 0xf43   : > { %v1707_v24 = vmul.f32 %v2028_v19, %v1706_v23 }
 0xf45   : > { %v1711_v6 = vsel %vm1710_vm14, %v2028_v19, %v1707_v24 }
 0xf46   : > { %v1712_v26 = vmul.f32 %v1711_v6, %v1695_v13 }
 0xf48   : > { %v1716_v29 = vmul.f32 %v1987_v25, %v1712_v26 }
 0xf4a   : > { %v1720_v31 = vadd.f32 %v1988_v27, %v1716_v29 }
 0xf4c   : > { %1721 = vst.msk [vmem:[%s725_s0] sm:$0xff] %vm769_vm0, %v1720_v31 }
 0xf4d   : > { %2056 = shalt.err (!%p2053_p3)
}
 0xf4e   : > { %1924 = dma.vmem_to_hbm [thread:$0]  (%p2264_p5), %s1736_s5, 128, %s1738_s24, %s1723_s6  }
 0xf4f PF: > { %s2652_s4 = sld [smem:[#allocation7_spill]] }
 0xf50   : > { %s2653_s25 = sld [smem:[#allocation5_spill]] }
 0xf55   : > { %p1930_p4 = scmp.ge.s32.totalorder %s2652_s4, 2 }
 0xf56   : > { %s1749_s8 = sand.u32 1, %s2653_s25  }
 0xf57   : > { %p1927_p7 = pnand %p1930_p4, %p2268_p6  ;;  %s1750_s3 = scalar_lea.sflag [#allocation3], %s1749_s8 }
 0xf59   : > { %p1928_p8 = pneg %p1927_p7 }
 0xf5b   : > { %2074 = dma.done.wait (%p1928_p8), %s1750_s3, 128  }
 0xf5c   : > { %2076 = vsyncadd (%p1928_p8), %s1750_s3, 4294967168  ;;  %s2655_s25 = sld [smem:[#allocation8_spill]]  ;;  %s2658_s4 = smov %s2083_s30 }
 0xf5d   : > { %s2656_s28 = sld [smem:[#allocation6_spill]] }
 0xf5e   : > { %s2657_s24 = sld [smem:[#allocation9_spill]] }
 0xf62   : > { %p33_p9 = scmp.ge.s32.totalorder %s2655_s25, 4  }
 0xf63   : > { %s2659_s30 = smov %s2656_s28 }
 0xf64   :  { %35 = sbr.rel (!%p33_p9) target bundleno = 13 (0xd), region = 159 }
 0xf69   :  { %1756 = vsyncpa [#allocation3], 1 }
 0xf6a   :  { %1758 = vsyncpa [#allocation3 + $0x1], 1 }

</bundles_post_ra>
